<compile_context>
chip_gen: v6e
topology: v6e:2x2x1
jax: 0.10.0
libtpu: 0.0.40
codegen_flags: <defaults>
</compile_context>

<pallas_src>
import functools

import numpy as np

import jax
import jax.numpy as jnp
from jax.experimental import pallas as pl
from jax.experimental.pallas import tpu as pltpu


_LANES = 128
_ROWS_PER_FLOW = 384  # [W1 | W2] (128 rows) + W3 (128 rows) + MIX (128 rows)


# ----------------------------------------------------------------------------
# Pallas kernel: the entire n-flow NormalizingFlow forward pass.
# ----------------------------------------------------------------------------
def _make_kernel(n_flows: int, dim: int):
    ld_start = (n_flows + 1) * dim  # lanes >= ld_start carry log_det in the slab

    def kernel(z_ref, p_ref, out_ref):
        B = z_ref.shape[0]
        lane = jax.lax.broadcasted_iota(jnp.int32, (B, _LANES), 1)
        # State slab.  Lane 127 is a constant-ones lane (biases folded into the
        # packed weights); state i lives in lanes [i*dim, (i+1)*dim).
        out = jnp.where(lane == _LANES - 1, 1.0, z_ref[...])
        log_det = jnp.zeros((B, 1), jnp.float32)

        def lrelu(h):
            return jnp.where(h > 0, h, 0.2 * h)

        for i in range(n_flows):  # static unroll; weights sliced at 8/128-aligned offsets
            r = i * _ROWS_PER_FLOW
            w1 = p_ref[r:r + 128, 0:128]          # fused s|t layer 1 (+ bias row)
            w2 = p_ref[r:r + 128, 128:256]        # block-diag layer 2 (+ bias row)
            w3 = p_ref[r + 128:r + 256, :]        # layer 3, outputs [s_scat | t_scat]
            mix = p_ref[r + 256:r + 384, :]       # permutations: [x1_scat | kept_scat]

            h = lrelu(jnp.dot(out, w1, preferred_element_type=jnp.float32))
            h = lrelu(jnp.dot(h, w2, preferred_element_type=jnp.float32))
            st = jnp.dot(h, w3, preferred_element_type=jnp.float32)    # [B, 256]
            xm = jnp.dot(out, mix, preferred_element_type=jnp.float32)  # [B, 256]

            s, t = st[:, 0:128], st[:, 128:256]       # 128-lane aligned slices
            x1, kept = xm[:, 0:128], xm[:, 128:256]

            # Affine coupling; padded lanes stay exactly zero (exp(0)*0 + 0).
            out = out + kept + jnp.exp(s) * x1 + t
            log_det = log_det + jnp.sum(s, axis=1, keepdims=True)

        # Single unmasked full-vreg store: states + broadcast log_det.
        out_ref[...] = jnp.where(lane >= ld_start, log_det, out)

    return kernel


# ----------------------------------------------------------------------------
# Host-side weight packing (exact 0/1 permutation + s/t fusion + bias folding).
# Done ONCE, outside the per-call path.
# ----------------------------------------------------------------------------
def pack_flow_params(flow_params, dim):
    n = len(flow_params)
    D = dim
    Dh = D // 2
    H = np.asarray(flow_params[0]["sw1"]).shape[1]
    assert (n + 1) * D <= _LANES - 1, "state windows + ones lane must fit in 128 lanes"
    assert 2 * H <= _LANES - 1, "fused hidden + ones lane must fit in 128 lanes"

    P = np.zeros((n * _ROWS_PER_FLOW, 2 * _LANES), np.float32)
    for i, p in enumerate(flow_params):
        g = {k: np.asarray(v, np.float32) for k, v in p.items() if k != "parity"}
        parity = int(p["parity"])
        even, odd = np.arange(0, D, 2), np.arange(1, D, 2)
        idx0 = odd if parity else even        # half feeding the MLPs (x0)
        idx1 = even if parity else odd        # half being transformed (x1)
        col0 = Dh if parity else 0            # where x0 lands in the output state
        col1 = 0 if parity else Dh            # where exp(s)*x1+t lands
        wi = i * D                            # input-state lane window
        wo = (i + 1) * D                      # output-state lane window
        base = i * _ROWS_PER_FLOW

        # Layer 1: x0-selection + input-window placement folded in; bias in row 127.
        w1 = np.zeros((128, 128), np.float32)
        w1[wi + idx0, 0:H] = g["sw1"]
        w1[wi + idx0, H:2 * H] = g["tw1"]
        w1[127, 0:H] = g["sb1"].reshape(-1)
        w1[127, H:2 * H] = g["tb1"].reshape(-1)
        w1[127, 127] = 1.0                    # propagate the ones lane

        # Layer 2: block-diagonal so the s/t paths stay independent.
        w2 = np.zeros((128, 128), np.float32)
        w2[0:H, 0:H] = g["sw2"]
        w2[H:2 * H, H:2 * H] = g["tw2"]
        w2[127, 0:H] = g["sb2"].reshape(-1)
        w2[127, H:2 * H] = g["tb2"].reshape(-1)
        w2[127, 127] = 1.0

        # Layer 3: emits s (cols [0,128)) and t (cols [128,256)) already scattered
        # to the *output* state window (Q1 folded in).
        w3 = np.zeros((128, 256), np.float32)
        w3[0:H, wo + col1: wo + col1 + Dh] = g["sw3"]
        w3[H:2 * H, 128 + wo + col1: 128 + wo + col1 + Dh] = g["tw3"]
        w3[127, wo + col1: wo + col1 + Dh] = g["sb3"].reshape(-1)
        w3[127, 128 + wo + col1: 128 + wo + col1 + Dh] = g["tb3"].reshape(-1)

        # MIX: x1 scattered to its output position (cols [0,128)) and x0 copied
        # ("kept") to its output position (cols [128,256)).  Pure 0/1 permutation.
        mix = np.zeros((128, 256), np.float32)
        mix[wi + idx1, wo + col1 + np.arange(Dh)] = 1.0
        mix[wi + idx0, 128 + wo + col0 + np.arange(Dh)] = 1.0

        P[base:base + 128, 0:128] = w1
        P[base:base + 128, 128:256] = w2
        P[base + 128:base + 256, :] = w3
        P[base + 256:base + 384, :] = mix
    return jnp.asarray(P)


# ----------------------------------------------------------------------------
# pallas_call wrapper.
# ----------------------------------------------------------------------------
def _run_fused_kernel(z_pad, packed, n_flows, dim):
    B = z_pad.shape[0]
    kernel = _make_kernel(n_flows, dim)
    out_shape = jax.ShapeDtypeStruct((B, _LANES), jnp.float32)

    if B > 128 and B % 128 == 0:
        # Large batch: grid over batch blocks; weights stay resident (block 0 for
        # every step); "parallel" lets megacore chips shard the batch axis.
        bb = 128
        return pl.pallas_call(
            kernel,
            grid=(B // bb,),
            in_specs=[
                pl.BlockSpec((bb, _LANES), lambda b: (b, 0)),
                pl.BlockSpec(packed.shape, lambda b: (0, 0)),
            ],
            out_specs=pl.BlockSpec((bb, _LANES), lambda b: (b, 0)),
            out_shape=out_shape,
            compiler_params=pltpu.CompilerParams(
                dimension_semantics=("parallel",)),
        )(z_pad, packed)

    # Small batch: single grid-less call, two input DMAs, one output DMA.
    return pl.pallas_call(kernel, out_shape=out_shape)(z_pad, packed)


@functools.partial(jax.jit, static_argnames=("n_flows", "dim"))
def normalizing_flow_forward(z, packed, *, n_flows, dim):
    """Mirrors NormalizingFlow.forward: returns (xs, log_det)."""
    z_pad = jnp.pad(z.astype(jnp.float32), ((0, 0), (0, _LANES - dim)))
    out = _run_fused_kernel(z_pad, packed, n_flows, dim)
    xs = [out[:, i * dim:(i + 1) * dim] for i in range(n_flows + 1)]
    log_det = out[:, _LANES - 1]
    return xs, log_det


# ----------------------------------------------------------------------------
# Pure-JAX reference (for correctness check).
# ----------------------------------------------------------------------------
def _mlp_ref(x, w1, b1, w2, b2, w3, b3):
    lrelu = lambda h: jnp.where(h > 0, h, 0.2 * h)
    h = lrelu(x @ w1 + b1)
    h = lrelu(h @ w2 + b2)
    return h @ w3 + b3


def normalizing_flow_ref(z, flow_params):
    B = z.shape[0]
    log_det = jnp.zeros((B,), dtype=jnp.float32)
    xs = [z]
    for p in flow_params:
        x0, x1 = z[:, ::2], z[:, 1::2]
        if p["parity"]:
            x0, x1 = x1, x0
        s = _mlp_ref(x0, p["sw1"], p["sb1"], p["sw2"], p["sb2"], p["sw3"], p["sb3"])
        t = _mlp_ref(x0, p["tw1"], p["tb1"], p["tw2"], p["tb2"], p["tw3"], p["tb3"])
        z0, z1 = x0, jnp.exp(s) * x1 + t
        if p["parity"]:
            z0, z1 = z1, z0
        z = jnp.concatenate([z0, z1], axis=1)
        log_det = log_det + jnp.sum(s, axis=1)
        xs.append(z)
    return xs, log_det


# ----------------------------------------------------------------------------
# Deterministic parameter init (PyTorch nn.Linear-style uniform bounds).
# ----------------------------------------------------------------------------
def init_flow_params(key, n_flows, dim, hidden):
    dh = dim // 2

    def linear(key, fan_in, fan_out):
        kw, kb = jax.random.split(key)
        bound = 1.0 / jnp.sqrt(fan_in)
        w = jax.random.uniform(kw, (fan_in, fan_out), jnp.float32, -bound, bound)
        b = jax.random.uniform(kb, (1, fan_out), jnp.float32, -bound, bound)
        return w, b

    flow_params = []
    for i in range(n_flows):
        key, *ks = jax.random.split(key, 7)
        sw1, sb1 = linear(ks[0], dh, hidden)
        sw2, sb2 = linear(ks[1], hidden, hidden)
        sw3, sb3 = linear(ks[2], hidden, dh)
        tw1, tb1 = linear(ks[3], dh, hidden)
        tw2, tb2 = linear(ks[4], hidden, hidden)
        tw3, tb3 = linear(ks[5], hidden, dh)
        flow_params.append(dict(
            parity=i % 2,
            sw1=sw1, sb1=sb1, sw2=sw2, sb2=sb2, sw3=sw3, sb3=sb3,
            tw1=tw1, tb1=tb1, tw2=tw2, tb2=tb2, tw3=tw3, tb3=tb3,
        ))
    return flow_params


# ----------------------------------------------------------------------------
if __name__ == "__main__":
    B, D, H, N_FLOWS = 8, 16, 32, 4

    key = jax.random.PRNGKey(0)
    k_z, k_p, k_z2 = jax.random.split(key, 3)
    z = jax.random.normal(k_z, (B, D), dtype=jnp.float32)
    flow_params = init_flow_params(k_p, N_FLOWS, D, H)

    # Pack/pad weights once (not in the per-call path).
    packed = pack_flow_params(flow_params, D)

    # Small batch (grid-less path).
    xs, log_det = normalizing_flow_forward(z, packed, n_flows=N_FLOWS, dim=D)
    jax.block_until_ready(log_det)
    jax.block_until_ready(xs[-1])

    xs_ref, log_det_ref = normalizing_flow_ref(z, flow_params)
    assert len(xs) == N_FLOWS + 1
    for a, b in zip(xs, xs_ref):
        assert jnp.allclose(a, b, atol=2e-5, rtol=2e-5)
    assert jnp.allclose(log_det, log_det_ref, atol=2e-5, rtol=2e-5)
    assert log_det.shape == (B,)

    # Larger batch exercises the batch-gridded (multi-TensorCore capable) path.
    B2 = 256
    z2 = jax.random.normal(k_z2, (B2, D), dtype=jnp.float32)
    xs2, log_det2 = normalizing_flow_forward(z2, packed, n_flows=N_FLOWS, dim=D)
    jax.block_until_ready(log_det2)
    xs2_ref, log_det2_ref = normalizing_flow_ref(z2, flow_params)
    for a, b in zip(xs2, xs2_ref):
        assert jnp.allclose(a, b, atol=2e-5, rtol=2e-5)
    assert jnp.allclose(log_det2, log_det2_ref, atol=2e-5, rtol=2e-5)

    print("KERNEL_OK")
</pallas_src>

<mosaic_0001>
module attributes {stable_mosaic.version = 11 : i64} {
  func.func @kernel(%arg0: memref<8x128xf32, #tpu.memory_space<vmem>>, %arg1: memref<1536x256xf32, #tpu.memory_space<vmem>>, %arg2: memref<8x128xf32, #tpu.memory_space<vmem>>) attributes {dimension_semantics = [], scalar_prefetch = 0 : i64, scratch_operands = 0 : i64, tpu.core_type = #tpu.core_type<tc>} {
    %0 = tpu.iota {dimensions = array<i32: 1>} : vector<8x128xi32>
    %c127_i32 = arith.constant 127 : i32
    %1 = vector.broadcast %c127_i32 : i32 to vector<8x128xi32>
    %2 = arith.cmpi eq, %0, %1 : vector<8x128xi32>
    %c0 = arith.constant 0 : index
    %c0_0 = arith.constant 0 : index
    %3 = vector.load %arg0[%c0, %c0_0] : memref<8x128xf32, #tpu.memory_space<vmem>>, vector<8x128xf32>
    %cst = arith.constant 1.000000e+00 : f32
    %4 = vector.broadcast %cst : f32 to vector<8x128xf32>
    %5 = arith.select %2, %4, %3 : vector<8x128xi1>, vector<8x128xf32>
    %cst_1 = arith.constant 0.000000e+00 : f32
    %6 = vector.broadcast %cst_1 : f32 to vector<8x1xf32>
    %c0_2 = arith.constant 0 : index
    %c0_3 = arith.constant 0 : index
    %7 = vector.load %arg1[%c0_2, %c0_3] : memref<1536x256xf32, #tpu.memory_space<vmem>>, vector<128x128xf32>
    %c0_4 = arith.constant 0 : index
    %c128 = arith.constant 128 : index
    %8 = vector.load %arg1[%c0_4, %c128] : memref<1536x256xf32, #tpu.memory_space<vmem>>, vector<128x128xf32>
    %c128_5 = arith.constant 128 : index
    %c0_6 = arith.constant 0 : index
    %9 = vector.load %arg1[%c128_5, %c0_6] : memref<1536x256xf32, #tpu.memory_space<vmem>>, vector<128x256xf32>
    %c256 = arith.constant 256 : index
    %c0_7 = arith.constant 0 : index
    %10 = vector.load %arg1[%c256, %c0_7] : memref<1536x256xf32, #tpu.memory_space<vmem>>, vector<128x256xf32>
    %cst_8 = arith.constant dense<0.000000e+00> : vector<8x128xf32>
    %11 = tpu.matmul %5, %7, %cst_8 {dimension_numbers = #tpu.dot_dimension_numbers<[1], [0], [0], [1], [0, 0, 1, 1], [], []>} : vector<8x128xf32>, vector<128x128xf32>, vector<8x128xf32> -> vector<8x128xf32>
    %cst_9 = arith.constant 0.000000e+00 : f32
    %12 = vector.broadcast %cst_9 : f32 to vector<8x128xf32>
    %13 = arith.cmpf ogt, %11, %12 : vector<8x128xf32>
    %cst_10 = arith.constant 2.000000e-01 : f32
    %14 = vector.broadcast %cst_10 : f32 to vector<8x128xf32>
    %15 = arith.mulf %14, %11 : vector<8x128xf32>
    %16 = arith.select %13, %11, %15 : vector<8x128xi1>, vector<8x128xf32>
    %cst_11 = arith.constant dense<0.000000e+00> : vector<8x128xf32>
    %17 = tpu.matmul %16, %8, %cst_11 {dimension_numbers = #tpu.dot_dimension_numbers<[1], [0], [0], [1], [0, 0, 1, 1], [], []>} : vector<8x128xf32>, vector<128x128xf32>, vector<8x128xf32> -> vector<8x128xf32>
    %cst_12 = arith.constant 0.000000e+00 : f32
    %18 = vector.broadcast %cst_12 : f32 to vector<8x128xf32>
    %19 = arith.cmpf ogt, %17, %18 : vector<8x128xf32>
    %cst_13 = arith.constant 2.000000e-01 : f32
    %20 = vector.broadcast %cst_13 : f32 to vector<8x128xf32>
    %21 = arith.mulf %20, %17 : vector<8x128xf32>
    %22 = arith.select %19, %17, %21 : vector<8x128xi1>, vector<8x128xf32>
    %cst_14 = arith.constant dense<0.000000e+00> : vector<8x256xf32>
    %23 = tpu.matmul %22, %9, %cst_14 {dimension_numbers = #tpu.dot_dimension_numbers<[1], [0], [0], [1], [0, 0, 1, 1], [], []>} : vector<8x128xf32>, vector<128x256xf32>, vector<8x256xf32> -> vector<8x256xf32>
    %cst_15 = arith.constant dense<0.000000e+00> : vector<8x256xf32>
    %24 = tpu.matmul %5, %10, %cst_15 {dimension_numbers = #tpu.dot_dimension_numbers<[1], [0], [0], [1], [0, 0, 1, 1], [], []>} : vector<8x128xf32>, vector<128x256xf32>, vector<8x256xf32> -> vector<8x256xf32>
    %25 = vector.extract_strided_slice %23 {offsets = [0, 0], sizes = [8, 128], strides = [1, 1]} : vector<8x256xf32> to vector<8x128xf32>
    %26 = vector.extract_strided_slice %23 {offsets = [0, 128], sizes = [8, 128], strides = [1, 1]} : vector<8x256xf32> to vector<8x128xf32>
    %27 = vector.extract_strided_slice %24 {offsets = [0, 0], sizes = [8, 128], strides = [1, 1]} : vector<8x256xf32> to vector<8x128xf32>
    %28 = vector.extract_strided_slice %24 {offsets = [0, 128], sizes = [8, 128], strides = [1, 1]} : vector<8x256xf32> to vector<8x128xf32>
    %29 = arith.addf %5, %28 : vector<8x128xf32>
    %30 = math.exp %25 : vector<8x128xf32>
    %31 = arith.mulf %30, %27 : vector<8x128xf32>
    %32 = arith.addf %29, %31 : vector<8x128xf32>
    %33 = arith.addf %32, %26 : vector<8x128xf32>
    %cst_16 = arith.constant dense<0.000000e+00> : vector<8xf32>
    %34 = vector.multi_reduction <add>, %25, %cst_16 [1] : vector<8x128xf32> to vector<8xf32>
    %35 = vector.shape_cast %34 : vector<8xf32> to vector<8x1xf32>
    %36 = arith.addf %6, %35 : vector<8x1xf32>
    %c384 = arith.constant 384 : index
    %c0_17 = arith.constant 0 : index
    %37 = vector.load %arg1[%c384, %c0_17] : memref<1536x256xf32, #tpu.memory_space<vmem>>, vector<128x128xf32>
    %c384_18 = arith.constant 384 : index
    %c128_19 = arith.constant 128 : index
    %38 = vector.load %arg1[%c384_18, %c128_19] : memref<1536x256xf32, #tpu.memory_space<vmem>>, vector<128x128xf32>
    %c512 = arith.constant 512 : index
    %c0_20 = arith.constant 0 : index
    %39 = vector.load %arg1[%c512, %c0_20] : memref<1536x256xf32, #tpu.memory_space<vmem>>, vector<128x256xf32>
    %c640 = arith.constant 640 : index
    %c0_21 = arith.constant 0 : index
    %40 = vector.load %arg1[%c640, %c0_21] : memref<1536x256xf32, #tpu.memory_space<vmem>>, vector<128x256xf32>
    %cst_22 = arith.constant dense<0.000000e+00> : vector<8x128xf32>
    %41 = tpu.matmul %33, %37, %cst_22 {dimension_numbers = #tpu.dot_dimension_numbers<[1], [0], [0], [1], [0, 0, 1, 1], [], []>} : vector<8x128xf32>, vector<128x128xf32>, vector<8x128xf32> -> vector<8x128xf32>
    %cst_23 = arith.constant 0.000000e+00 : f32
    %42 = vector.broadcast %cst_23 : f32 to vector<8x128xf32>
    %43 = arith.cmpf ogt, %41, %42 : vector<8x128xf32>
    %cst_24 = arith.constant 2.000000e-01 : f32
    %44 = vector.broadcast %cst_24 : f32 to vector<8x128xf32>
    %45 = arith.mulf %44, %41 : vector<8x128xf32>
    %46 = arith.select %43, %41, %45 : vector<8x128xi1>, vector<8x128xf32>
    %cst_25 = arith.constant dense<0.000000e+00> : vector<8x128xf32>
    %47 = tpu.matmul %46, %38, %cst_25 {dimension_numbers = #tpu.dot_dimension_numbers<[1], [0], [0], [1], [0, 0, 1, 1], [], []>} : vector<8x128xf32>, vector<128x128xf32>, vector<8x128xf32> -> vector<8x128xf32>
    %cst_26 = arith.constant 0.000000e+00 : f32
    %48 = vector.broadcast %cst_26 : f32 to vector<8x128xf32>
    %49 = arith.cmpf ogt, %47, %48 : vector<8x128xf32>
    %cst_27 = arith.constant 2.000000e-01 : f32
    %50 = vector.broadcast %cst_27 : f32 to vector<8x128xf32>
    %51 = arith.mulf %50, %47 : vector<8x128xf32>
    %52 = arith.select %49, %47, %51 : vector<8x128xi1>, vector<8x128xf32>
    %cst_28 = arith.constant dense<0.000000e+00> : vector<8x256xf32>
    %53 = tpu.matmul %52, %39, %cst_28 {dimension_numbers = #tpu.dot_dimension_numbers<[1], [0], [0], [1], [0, 0, 1, 1], [], []>} : vector<8x128xf32>, vector<128x256xf32>, vector<8x256xf32> -> vector<8x256xf32>
    %cst_29 = arith.constant dense<0.000000e+00> : vector<8x256xf32>
    %54 = tpu.matmul %33, %40, %cst_29 {dimension_numbers = #tpu.dot_dimension_numbers<[1], [0], [0], [1], [0, 0, 1, 1], [], []>} : vector<8x128xf32>, vector<128x256xf32>, vector<8x256xf32> -> vector<8x256xf32>
    %55 = vector.extract_strided_slice %53 {offsets = [0, 0], sizes = [8, 128], strides = [1, 1]} : vector<8x256xf32> to vector<8x128xf32>
    %56 = vector.extract_strided_slice %53 {offsets = [0, 128], sizes = [8, 128], strides = [1, 1]} : vector<8x256xf32> to vector<8x128xf32>
    %57 = vector.extract_strided_slice %54 {offsets = [0, 0], sizes = [8, 128], strides = [1, 1]} : vector<8x256xf32> to vector<8x128xf32>
    %58 = vector.extract_strided_slice %54 {offsets = [0, 128], sizes = [8, 128], strides = [1, 1]} : vector<8x256xf32> to vector<8x128xf32>
    %59 = arith.addf %33, %58 : vector<8x128xf32>
    %60 = math.exp %55 : vector<8x128xf32>
    %61 = arith.mulf %60, %57 : vector<8x128xf32>
    %62 = arith.addf %59, %61 : vector<8x128xf32>
    %63 = arith.addf %62, %56 : vector<8x128xf32>
    %cst_30 = arith.constant dense<0.000000e+00> : vector<8xf32>
    %64 = vector.multi_reduction <add>, %55, %cst_30 [1] : vector<8x128xf32> to vector<8xf32>
    %65 = vector.shape_cast %64 : vector<8xf32> to vector<8x1xf32>
    %66 = arith.addf %36, %65 : vector<8x1xf32>
    %c768 = arith.constant 768 : index
    %c0_31 = arith.constant 0 : index
    %67 = vector.load %arg1[%c768, %c0_31] : memref<1536x256xf32, #tpu.memory_space<vmem>>, vector<128x128xf32>
    %c768_32 = arith.constant 768 : index
    %c128_33 = arith.constant 128 : index
    %68 = vector.load %arg1[%c768_32, %c128_33] : memref<1536x256xf32, #tpu.memory_space<vmem>>, vector<128x128xf32>
    %c896 = arith.constant 896 : index
    %c0_34 = arith.constant 0 : index
    %69 = vector.load %arg1[%c896, %c0_34] : memref<1536x256xf32, #tpu.memory_space<vmem>>, vector<128x256xf32>
    %c1024 = arith.constant 1024 : index
    %c0_35 = arith.constant 0 : index
    %70 = vector.load %arg1[%c1024, %c0_35] : memref<1536x256xf32, #tpu.memory_space<vmem>>, vector<128x256xf32>
    %cst_36 = arith.constant dense<0.000000e+00> : vector<8x128xf32>
    %71 = tpu.matmul %63, %67, %cst_36 {dimension_numbers = #tpu.dot_dimension_numbers<[1], [0], [0], [1], [0, 0, 1, 1], [], []>} : vector<8x128xf32>, vector<128x128xf32>, vector<8x128xf32> -> vector<8x128xf32>
    %cst_37 = arith.constant 0.000000e+00 : f32
    %72 = vector.broadcast %cst_37 : f32 to vector<8x128xf32>
    %73 = arith.cmpf ogt, %71, %72 : vector<8x128xf32>
    %cst_38 = arith.constant 2.000000e-01 : f32
    %74 = vector.broadcast %cst_38 : f32 to vector<8x128xf32>
    %75 = arith.mulf %74, %71 : vector<8x128xf32>
    %76 = arith.select %73, %71, %75 : vector<8x128xi1>, vector<8x128xf32>
    %cst_39 = arith.constant dense<0.000000e+00> : vector<8x128xf32>
    %77 = tpu.matmul %76, %68, %cst_39 {dimension_numbers = #tpu.dot_dimension_numbers<[1], [0], [0], [1], [0, 0, 1, 1], [], []>} : vector<8x128xf32>, vector<128x128xf32>, vector<8x128xf32> -> vector<8x128xf32>
    %cst_40 = arith.constant 0.000000e+00 : f32
    %78 = vector.broadcast %cst_40 : f32 to vector<8x128xf32>
    %79 = arith.cmpf ogt, %77, %78 : vector<8x128xf32>
    %cst_41 = arith.constant 2.000000e-01 : f32
    %80 = vector.broadcast %cst_41 : f32 to vector<8x128xf32>
    %81 = arith.mulf %80, %77 : vector<8x128xf32>
    %82 = arith.select %79, %77, %81 : vector<8x128xi1>, vector<8x128xf32>
    %cst_42 = arith.constant dense<0.000000e+00> : vector<8x256xf32>
    %83 = tpu.matmul %82, %69, %cst_42 {dimension_numbers = #tpu.dot_dimension_numbers<[1], [0], [0], [1], [0, 0, 1, 1], [], []>} : vector<8x128xf32>, vector<128x256xf32>, vector<8x256xf32> -> vector<8x256xf32>
    %cst_43 = arith.constant dense<0.000000e+00> : vector<8x256xf32>
    %84 = tpu.matmul %63, %70, %cst_43 {dimension_numbers = #tpu.dot_dimension_numbers<[1], [0], [0], [1], [0, 0, 1, 1], [], []>} : vector<8x128xf32>, vector<128x256xf32>, vector<8x256xf32> -> vector<8x256xf32>
    %85 = vector.extract_strided_slice %83 {offsets = [0, 0], sizes = [8, 128], strides = [1, 1]} : vector<8x256xf32> to vector<8x128xf32>
    %86 = vector.extract_strided_slice %83 {offsets = [0, 128], sizes = [8, 128], strides = [1, 1]} : vector<8x256xf32> to vector<8x128xf32>
    %87 = vector.extract_strided_slice %84 {offsets = [0, 0], sizes = [8, 128], strides = [1, 1]} : vector<8x256xf32> to vector<8x128xf32>
    %88 = vector.extract_strided_slice %84 {offsets = [0, 128], sizes = [8, 128], strides = [1, 1]} : vector<8x256xf32> to vector<8x128xf32>
    %89 = arith.addf %63, %88 : vector<8x128xf32>
    %90 = math.exp %85 : vector<8x128xf32>
    %91 = arith.mulf %90, %87 : vector<8x128xf32>
    %92 = arith.addf %89, %91 : vector<8x128xf32>
    %93 = arith.addf %92, %86 : vector<8x128xf32>
    %cst_44 = arith.constant dense<0.000000e+00> : vector<8xf32>
    %94 = vector.multi_reduction <add>, %85, %cst_44 [1] : vector<8x128xf32> to vector<8xf32>
    %95 = vector.shape_cast %94 : vector<8xf32> to vector<8x1xf32>
    %96 = arith.addf %66, %95 : vector<8x1xf32>
    %c1152 = arith.constant 1152 : index
    %c0_45 = arith.constant 0 : index
    %97 = vector.load %arg1[%c1152, %c0_45] : memref<1536x256xf32, #tpu.memory_space<vmem>>, vector<128x128xf32>
    %c1152_46 = arith.constant 1152 : index
    %c128_47 = arith.constant 128 : index
    %98 = vector.load %arg1[%c1152_46, %c128_47] : memref<1536x256xf32, #tpu.memory_space<vmem>>, vector<128x128xf32>
    %c1280 = arith.constant 1280 : index
    %c0_48 = arith.constant 0 : index
    %99 = vector.load %arg1[%c1280, %c0_48] : memref<1536x256xf32, #tpu.memory_space<vmem>>, vector<128x256xf32>
    %c1408 = arith.constant 1408 : index
    %c0_49 = arith.constant 0 : index
    %100 = vector.load %arg1[%c1408, %c0_49] : memref<1536x256xf32, #tpu.memory_space<vmem>>, vector<128x256xf32>
    %cst_50 = arith.constant dense<0.000000e+00> : vector<8x128xf32>
    %101 = tpu.matmul %93, %97, %cst_50 {dimension_numbers = #tpu.dot_dimension_numbers<[1], [0], [0], [1], [0, 0, 1, 1], [], []>} : vector<8x128xf32>, vector<128x128xf32>, vector<8x128xf32> -> vector<8x128xf32>
    %cst_51 = arith.constant 0.000000e+00 : f32
    %102 = vector.broadcast %cst_51 : f32 to vector<8x128xf32>
    %103 = arith.cmpf ogt, %101, %102 : vector<8x128xf32>
    %cst_52 = arith.constant 2.000000e-01 : f32
    %104 = vector.broadcast %cst_52 : f32 to vector<8x128xf32>
    %105 = arith.mulf %104, %101 : vector<8x128xf32>
    %106 = arith.select %103, %101, %105 : vector<8x128xi1>, vector<8x128xf32>
    %cst_53 = arith.constant dense<0.000000e+00> : vector<8x128xf32>
    %107 = tpu.matmul %106, %98, %cst_53 {dimension_numbers = #tpu.dot_dimension_numbers<[1], [0], [0], [1], [0, 0, 1, 1], [], []>} : vector<8x128xf32>, vector<128x128xf32>, vector<8x128xf32> -> vector<8x128xf32>
    %cst_54 = arith.constant 0.000000e+00 : f32
    %108 = vector.broadcast %cst_54 : f32 to vector<8x128xf32>
    %109 = arith.cmpf ogt, %107, %108 : vector<8x128xf32>
    %cst_55 = arith.constant 2.000000e-01 : f32
    %110 = vector.broadcast %cst_55 : f32 to vector<8x128xf32>
    %111 = arith.mulf %110, %107 : vector<8x128xf32>
    %112 = arith.select %109, %107, %111 : vector<8x128xi1>, vector<8x128xf32>
    %cst_56 = arith.constant dense<0.000000e+00> : vector<8x256xf32>
    %113 = tpu.matmul %112, %99, %cst_56 {dimension_numbers = #tpu.dot_dimension_numbers<[1], [0], [0], [1], [0, 0, 1, 1], [], []>} : vector<8x128xf32>, vector<128x256xf32>, vector<8x256xf32> -> vector<8x256xf32>
    %cst_57 = arith.constant dense<0.000000e+00> : vector<8x256xf32>
    %114 = tpu.matmul %93, %100, %cst_57 {dimension_numbers = #tpu.dot_dimension_numbers<[1], [0], [0], [1], [0, 0, 1, 1], [], []>} : vector<8x128xf32>, vector<128x256xf32>, vector<8x256xf32> -> vector<8x256xf32>
    %115 = vector.extract_strided_slice %113 {offsets = [0, 0], sizes = [8, 128], strides = [1, 1]} : vector<8x256xf32> to vector<8x128xf32>
    %116 = vector.extract_strided_slice %113 {offsets = [0, 128], sizes = [8, 128], strides = [1, 1]} : vector<8x256xf32> to vector<8x128xf32>
    %117 = vector.extract_strided_slice %114 {offsets = [0, 0], sizes = [8, 128], strides = [1, 1]} : vector<8x256xf32> to vector<8x128xf32>
    %118 = vector.extract_strided_slice %114 {offsets = [0, 128], sizes = [8, 128], strides = [1, 1]} : vector<8x256xf32> to vector<8x128xf32>
    %119 = arith.addf %93, %118 : vector<8x128xf32>
    %120 = math.exp %115 : vector<8x128xf32>
    %121 = arith.mulf %120, %117 : vector<8x128xf32>
    %122 = arith.addf %119, %121 : vector<8x128xf32>
    %123 = arith.addf %122, %116 : vector<8x128xf32>
    %cst_58 = arith.constant dense<0.000000e+00> : vector<8xf32>
    %124 = vector.multi_reduction <add>, %115, %cst_58 [1] : vector<8x128xf32> to vector<8xf32>
    %125 = vector.shape_cast %124 : vector<8xf32> to vector<8x1xf32>
    %126 = arith.addf %96, %125 : vector<8x1xf32>
    %c80_i32 = arith.constant 80 : i32
    %127 = vector.broadcast %c80_i32 : i32 to vector<8x128xi32>
    %128 = arith.cmpi sge, %0, %127 : vector<8x128xi32>
    %129 = vector.shape_cast %126 : vector<8x1xf32> to vector<8x1xf32>
    %130 = vector.broadcast %129 : vector<8x1xf32> to vector<8x128xf32>
    %131 = arith.select %128, %130, %123 : vector<8x128xi1>, vector<8x128xf32>
    %c0_59 = arith.constant 0 : index
    %c0_60 = arith.constant 0 : index
    %132 = vector.load %arg2[%c0_59, %c0_60] : memref<8x128xf32, #tpu.memory_space<vmem>>, vector<8x128xf32>
    tpu.vector_store %arg2[%c0_59, %c0_60], %131 {strides = array<i32>} : memref<8x128xf32, #tpu.memory_space<vmem>>, vector<8x128xf32>,
    return
  }
}

</mosaic_0001>

<bundles_post_ra>
// kernel: normalizing_flow_forward.1
= control target key start
LH: loop header
LB: loop body
LE: loop exit
PB: predicated region body
PF: predicated region fallthrough
CT: control target
= control target key end

     0   :  { %7 = vsyncpa [#allocation3], 0  ;;  %s2061_s9 = smov [#allocation2]   ;;  %s2266_s0 = inlined_call_operand.vmem [shape: f32[8,128], index: 0, kind: input, shape index: {}]   ;;  %s2267_s1 = inlined_call_operand.hbm [shape: f32[1536,256], index: 1, kind: input, shape index: {}]   ;;  %s2268_s2 = inlined_call_operand.vmem [shape: f32[8,128], index: 2, kind: output, shape index: {}]  }
   0x1   :  { %s15_s10 = sshll.u32 %s2061_s9, 4  ;;  %s16_s10 = int_to_ptr.vmem [resolvable:$true] %s15_s10 }
   0x2   :  { %s2047_s11 = scalar_lea.vmem %s16_s10, 49152  ;;  %p2052_p1 = scmp.lt.s32.totalorder %s16_s10, %s16_s10 }
   0x3   :  { %p2048_p0 = scmp.ne.s32.totalorder %s16_s10, %s2047_s11  ;;  %p2053_p2 = scmp.lt.s32.totalorder %s2047_s11, %s2047_s11 }
   0x5   :  { %p2054_p3 = por %p2053_p2, %p2052_p1 }
   0x7   :  { %p2055_p4 = pnand %p2054_p3, %p2048_p0 }
   0x9   :  { %2058 = shalt.err (!%p2055_p4)
}
   0xa   :  { %s2062_s12 = smov 256   ;;  %s2063_s13 = smov 16  }
   0xb   :  { %21 = dma.hbm_to_vmem [thread:$0]  %s2267_s1, 49152, %s16_s10, [#allocation3], %s2062_s12, %s2062_s12, %s2063_s13  }
   0xc   :  { %2059 = dma.done.wait [#allocation3], 49152  }
   0xd   :  { %2060 = vsyncadd [#allocation3], 4294918144  ;;  %v2064_v0 = vmov 0.0   ;;  %vm2065_vm0 = vmmov 0   ;;  %v45_v1 = vld [vmem:[#allocation2 + $0xf0] sm:$0xff]  ;;  %v44_v2 = vld [vmem:[#allocation2 + $0xe0] sm:$0xff]  ;;  %v25_v20 = vlaneseq }
   0xe   :  { %1746 = vmatprep.subr.mxu0 %v2064_v0  ;;  %1778 = vmatprep.mubr.msk.f32.mxu0 %vm2065_vm0, %v2064_v0  ;;  %v43_v3 = vld [vmem:[#allocation2 + $0xd0] sm:$0xff]  ;;  %v42_v4 = vld [vmem:[#allocation2 + $0xc0] sm:$0xff]  ;;  %v61_v5 = vld [vmem:[#allocation2 + $0xf8] sm:$0xff] }
   0xf   :  { %1781 = vmatprep.subr.mxu1 %v2064_v0  ;;  %1813 = vmatprep.mubr.msk.f32.mxu1 %vm2065_vm0, %v2064_v0  ;;  %v41_v6 = vld [vmem:[#allocation2 + $0xb0] sm:$0xff]  ;;  %v60_v7 = vld [vmem:[#allocation2 + $0xe8] sm:$0xff]  ;;  %v59_v8 = vld [vmem:[#allocation2 + $0xd8] sm:$0xff]  ;;  %v2109_v25 = vand.u32 127, %v25_v20 }
  0x10   :  { %1747 = vmatpush3.msra.mxu0 %v45_v1  ;;  %1782 = vmatpush3.msra.mxu1 %v61_v5  ;;  %v40_v9 = vld [vmem:[#allocation2 + $0xa0] sm:$0xff]  ;;  %v58_v10 = vld [vmem:[#allocation2 + $0xc8] sm:$0xff]  ;;  %v39_v11 = vld [vmem:[#allocation2 + $0x90] sm:$0xff] }
  0x11   :  { %1748 = vmatprep.subr.mxu0 %v2064_v0  ;;  %1783 = vmatprep.subr.mxu1 %v2064_v0  ;;  %v57_v12 = vld [vmem:[#allocation2 + $0xb8] sm:$0xff]  ;;  %v38_v13 = vld [vmem:[#allocation2 + $0x80] sm:$0xff]  ;;  %v56_v14 = vld [vmem:[#allocation2 + $0xa8] sm:$0xff]  ;;  %vm27_vm1 = vcmp.eq.s32.totalorder %v2109_v25, 127  ;;  %vm1602_vm10 = vcmp.ge.s32.totalorder %v2109_v25, 80 }
  0x12   :  { %1749 = vmatpush3.msra.mxu0 %v44_v2  ;;  %1784 = vmatpush3.msra.mxu1 %v60_v7  ;;  %v37_v15 = vld [vmem:[#allocation2 + $0x70] sm:$0xff]  ;;  %v55_v16 = vld [vmem:[#allocation2 + $0x98] sm:$0xff]  ;;  %v36_v17 = vld [vmem:[#allocation2 + $0x60] sm:$0xff] }
  0x13   :  { %1750 = vmatprep.subr.mxu0 %v2064_v0  ;;  %1785 = vmatprep.subr.mxu1 %v2064_v0  ;;  %v54_v18 = vld [vmem:[#allocation2 + $0x88] sm:$0xff]  ;;  %v35_v19 = vld [vmem:[#allocation2 + $0x50] sm:$0xff]  ;;  %v53_v21 = vld [vmem:[#allocation2 + $0x78] sm:$0xff] }
  0x14   :  { %1751 = vmatpush3.msra.mxu0 %v43_v3  ;;  %1786 = vmatpush3.msra.mxu1 %v59_v8  ;;  %v34_v22 = vld [vmem:[#allocation2 + $0x40] sm:$0xff]  ;;  %v52_v23 = vld [vmem:[#allocation2 + $0x68] sm:$0xff]  ;;  %v33_v24 = vld [vmem:[#allocation2 + $0x30] sm:$0xff] }
  0x15   :  { %1752 = vmatprep.subr.mxu0 %v2064_v0  ;;  %1787 = vmatprep.subr.mxu1 %v2064_v0  ;;  %v51_v26 = vld [vmem:[#allocation2 + $0x58] sm:$0xff]  ;;  %v32_v27 = vld [vmem:[#allocation2 + $0x20] sm:$0xff]  ;;  %v50_v28 = vld [vmem:[#allocation2 + $0x48] sm:$0xff] }
  0x16   :  { %1753 = vmatpush3.msra.mxu0 %v42_v4  ;;  %1788 = vmatpush3.msra.mxu1 %v58_v10  ;;  %v31_v29 = vld [vmem:[#allocation2 + $0x10] sm:$0xff]  ;;  %v28_v30 = vld [vmem:[%s2266_s0] sm:$0xff]  ;;  %v49_v31 = vld [vmem:[#allocation2 + $0x38] sm:$0xff] }
  0x17   :  { %1754 = vmatprep.subr.mxu0 %v2064_v0  ;;  %1789 = vmatprep.subr.mxu1 %v2064_v0  ;;  %v30_v32 = vld [vmem:[#allocation2] sm:$0xff]  ;;  %v2121_v33 = vsel %vm27_vm1, 1.0, %v28_v30  ;;  %v48_v34 = vld [vmem:[#allocation2 + $0x28] sm:$0xff]  ;;  %v47_v35 = vld [vmem:[#allocation2 + $0x18] sm:$0xff] }
  0x18   :  { %1755 = vmatpush3.msra.mxu0 %v41_v6  ;;  %1790 = vmatpush3.msra.mxu1 %v57_v12  ;;  %v46_v36 = vld [vmem:[#allocation2 + $0x8] sm:$0xff]  ;;  %v93_v37 = vld [vmem:[#allocation2 + $0x1f8] sm:$0xff]  ;;  %v92_v38 = vld [vmem:[#allocation2 + $0x1f0] sm:$0xff] }
  0x19   :  { %1756 = vmatprep.subr.mxu0 %v2064_v0  ;;  %1791 = vmatprep.subr.mxu1 %v2064_v0  ;;  %v91_v39 = vld [vmem:[#allocation2 + $0x1e8] sm:$0xff]  ;;  %v90_v40 = vld [vmem:[#allocation2 + $0x1e0] sm:$0xff]  ;;  %v89_v41 = vld [vmem:[#allocation2 + $0x1d8] sm:$0xff] }
  0x1a   :  { %1757 = vmatpush3.msra.mxu0 %v40_v9  ;;  %1792 = vmatpush3.msra.mxu1 %v56_v14  ;;  %v88_v42 = vld [vmem:[#allocation2 + $0x1d0] sm:$0xff]  ;;  %v87_v43 = vld [vmem:[#allocation2 + $0x1c8] sm:$0xff]  ;;  %v125_v44 = vld [vmem:[#allocation2 + $0x2f8] sm:$0xff] }
  0x1b   :  { %1758 = vmatprep.subr.mxu0 %v2064_v0  ;;  %1793 = vmatprep.subr.mxu1 %v2064_v0  ;;  %v86_v45 = vld [vmem:[#allocation2 + $0x1c0] sm:$0xff]  ;;  %v85_v46 = vld [vmem:[#allocation2 + $0x1b8] sm:$0xff]  ;;  %v84_v47 = vld [vmem:[#allocation2 + $0x1b0] sm:$0xff] }
  0x1c   :  { %1759 = vmatpush3.msra.mxu0 %v39_v11  ;;  %1794 = vmatpush3.msra.mxu1 %v55_v16  ;;  %v83_v48 = vld [vmem:[#allocation2 + $0x1a8] sm:$0xff]  ;;  %v82_v49 = vld [vmem:[#allocation2 + $0x1a0] sm:$0xff]  ;;  %v81_v50 = vld [vmem:[#allocation2 + $0x198] sm:$0xff] }
  0x1d   :  { %1760 = vmatprep.subr.mxu0 %v2064_v0  ;;  %1795 = vmatprep.subr.mxu1 %v2064_v0  ;;  %v80_v51 = vld [vmem:[#allocation2 + $0x190] sm:$0xff]  ;;  %v79_v52 = vld [vmem:[#allocation2 + $0x188] sm:$0xff]  ;;  %v78_v53 = vld [vmem:[#allocation2 + $0x180] sm:$0xff] }
  0x1e   :  { %1761 = vmatpush3.msra.mxu0 %v38_v13  ;;  %1796 = vmatpush3.msra.mxu1 %v54_v18  ;;  %v77_v54 = vld [vmem:[#allocation2 + $0x178] sm:$0xff]  ;;  %v76_v55 = vld [vmem:[#allocation2 + $0x170] sm:$0xff]  ;;  %v75_v56 = vld [vmem:[#allocation2 + $0x168] sm:$0xff] }
  0x1f   :  { %1762 = vmatprep.subr.mxu0 %v2064_v0  ;;  %1797 = vmatprep.subr.mxu1 %v2064_v0  ;;  %v74_v57 = vld [vmem:[#allocation2 + $0x160] sm:$0xff]  ;;  %v73_v58 = vld [vmem:[#allocation2 + $0x158] sm:$0xff]  ;;  %v72_v59 = vld [vmem:[#allocation2 + $0x150] sm:$0xff] }
  0x20   :  { %1763 = vmatpush3.msra.mxu0 %v37_v15  ;;  %1798 = vmatpush3.msra.mxu1 %v53_v21  ;;  %v71_v60 = vld [vmem:[#allocation2 + $0x148] sm:$0xff]  ;;  %v70_v61 = vld [vmem:[#allocation2 + $0x140] sm:$0xff]  ;;  %v69_v62 = vld [vmem:[#allocation2 + $0x138] sm:$0xff] }
  0x21   :  { %1764 = vmatprep.subr.mxu0 %v2064_v0  ;;  %1799 = vmatprep.subr.mxu1 %v2064_v0  ;;  %v68_v63 = vld [vmem:[#allocation2 + $0x130] sm:$0xff]  ;;  %v67_v1 = vld [vmem:[#allocation2 + $0x128] sm:$0xff]  ;;  %v66_v2 = vld [vmem:[#allocation2 + $0x120] sm:$0xff] }
  0x22   :  { %1765 = vmatpush3.msra.mxu0 %v36_v17  ;;  %1800 = vmatpush3.msra.mxu1 %v52_v23  ;;  %v124_v6 = vld [vmem:[#allocation2 + $0x2f0] sm:$0xff]  ;;  %v123_v8 = vld [vmem:[#allocation2 + $0x2e8] sm:$0xff]  ;;  %v122_v9 = vld [vmem:[#allocation2 + $0x2e0] sm:$0xff] }
  0x23   :  { %1766 = vmatprep.subr.mxu0 %v2064_v0  ;;  %1801 = vmatprep.subr.mxu1 %v2064_v0  ;;  %v121_v10 = vld [vmem:[#allocation2 + $0x2d8] sm:$0xff]  ;;  %v120_v11 = vld [vmem:[#allocation2 + $0x2d0] sm:$0xff]  ;;  %v119_v12 = vld [vmem:[#allocation2 + $0x2c8] sm:$0xff] }
  0x24   :  { %1767 = vmatpush3.msra.mxu0 %v35_v19  ;;  %1802 = vmatpush3.msra.mxu1 %v51_v26  ;;  %v118_v13 = vld [vmem:[#allocation2 + $0x2c0] sm:$0xff]  ;;  %v117_v14 = vld [vmem:[#allocation2 + $0x2b8] sm:$0xff]  ;;  %v116_v15 = vld [vmem:[#allocation2 + $0x2b0] sm:$0xff] }
  0x25   :  { %1768 = vmatprep.subr.mxu0 %v2064_v0  ;;  %1803 = vmatprep.subr.mxu1 %v2064_v0  ;;  %v115_v16 = vld [vmem:[#allocation2 + $0x2a8] sm:$0xff]  ;;  %v114_v17 = vld [vmem:[#allocation2 + $0x2a0] sm:$0xff]  ;;  %v113_v18 = vld [vmem:[#allocation2 + $0x298] sm:$0xff] }
  0x26   :  { %1769 = vmatpush3.msra.mxu0 %v34_v22  ;;  %1804 = vmatpush3.msra.mxu1 %v50_v28  ;;  %v112_v19 = vld [vmem:[#allocation2 + $0x290] sm:$0xff]  ;;  %v111_v20 = vld [vmem:[#allocation2 + $0x288] sm:$0xff]  ;;  %v110_v21 = vld [vmem:[#allocation2 + $0x280] sm:$0xff] }
  0x27   :  { %1770 = vmatprep.subr.mxu0 %v2064_v0  ;;  %1805 = vmatprep.subr.mxu1 %v2064_v0  ;;  %v65_v22 = vld [vmem:[#allocation2 + $0x118] sm:$0xff]  ;;  %v108_v26 = vld [vmem:[#allocation2 + $0x270] sm:$0xff]  ;;  %v107_v28 = vld [vmem:[#allocation2 + $0x268] sm:$0xff] }
  0x28   :  { %1771 = vmatpush3.msra.mxu0 %v33_v24  ;;  %1806 = vmatpush3.msra.mxu1 %v49_v31  ;;  %v109_v23 = vld [vmem:[#allocation2 + $0x278] sm:$0xff]  ;;  %v64_v24 = vld [vmem:[#allocation2 + $0x110] sm:$0xff]  ;;  %v106_v30 = vld [vmem:[#allocation2 + $0x260] sm:$0xff] }
  0x29   :  { %1772 = vmatprep.subr.mxu0 %v2064_v0  ;;  %1807 = vmatprep.subr.mxu1 %v2064_v0  ;;  %v105_v31 = vld [vmem:[#allocation2 + $0x258] sm:$0xff] }
  0x2a   :  { %1773 = vmatpush3.msra.mxu0 %v32_v27  ;;  %1808 = vmatpush3.msra.mxu1 %v48_v34  ;;  %v63_v27 = vld [vmem:[#allocation2 + $0x108] sm:$0xff] }
  0x2b   :  { %1774 = vmatprep.subr.mxu0 %v2064_v0  ;;  %1809 = vmatprep.subr.mxu1 %v2064_v0  ;;  %v103_v34 = vld [vmem:[#allocation2 + $0x248] sm:$0xff] }
  0x2c   :  { %1775 = vmatpush3.msra.mxu0 %v31_v29  ;;  %1810 = vmatpush3.msra.mxu1 %v47_v35  ;;  %v62_v29 = vld [vmem:[#allocation2 + $0x100] sm:$0xff] }
  0x2d   :  { %1776 = vmatprep.subr.mxu0 %v2064_v0  ;;  %1811 = vmatprep.subr.mxu1 %v2064_v0  ;;  %v102_v35 = vld [vmem:[#allocation2 + $0x240] sm:$0xff] }
  0x2e   :  { %1777 = vmatpush3.msra.mxu0 %v30_v32  ;;  %1812 = vmatpush3.msra.mxu1 %v46_v36  ;;  %v104_v32 = vld [vmem:[#allocation2 + $0x250] sm:$0xff]  ;;  %v101_v36 = vld [vmem:[#allocation2 + $0x238] sm:$0xff] }
  0x2f   :  { %1779 = vmatmul.mubr.f32.vlgmr.msra.gmra.mxu0 %v2121_v33  ;;  %272 = vmatprep.subr.mxu0 %v93_v37  ;;  %v100_v37 = vld [vmem:[#allocation2 + $0x230] sm:$0xff] }
  0x30   :  { %336 = vmatprep.mubr.f32.mxu0 %v2064_v0  ;;  %273 = vmatpush1.msra.mxu0 %v92_v38  ;;  %v99_v38 = vld [vmem:[#allocation2 + $0x228] sm:$0xff] }
  0x31   :  { %274 = vmatprep.subr.mxu0 %v91_v39  ;;  %343 = vmatprep.subr.mxu1 %v125_v44  ;;  %v98_v39 = vld [vmem:[#allocation2 + $0x220] sm:$0xff] }
  0x32   :  { %275 = vmatpush1.msra.mxu0 %v90_v40  ;;  %v97_v40 = vld [vmem:[#allocation2 + $0x218] sm:$0xff] }
  0x33   :  { %276 = vmatprep.subr.mxu0 %v89_v41  ;;  %v96_v41 = vld [vmem:[#allocation2 + $0x210] sm:$0xff] }
  0x34   :  { %277 = vmatpush1.msra.mxu0 %v88_v42  ;;  %v95_v42 = vld [vmem:[#allocation2 + $0x208] sm:$0xff] }
  0x35   :  { %278 = vmatprep.subr.mxu0 %v87_v43  ;;  %v94_v43 = vld [vmem:[#allocation2 + $0x200] sm:$0xff] }
  0x36   :  { %279 = vmatpush1.msra.mxu0 %v86_v45 }
  0x37   :  { %280 = vmatprep.subr.mxu0 %v85_v46 }
  0x38   :  { %281 = vmatpush1.msra.mxu0 %v84_v47  ;;  %v438_v47 = vld [vmem:[#allocation2 + $0x3f0] sm:$0xff] }
  0x39   :  { %282 = vmatprep.subr.mxu0 %v83_v48 }
  0x3a   :  { %283 = vmatpush1.msra.mxu0 %v82_v49  ;;  %v437_v49 = vld [vmem:[#allocation2 + $0x3e0] sm:$0xff] }
  0x3b   :  { %284 = vmatprep.subr.mxu0 %v81_v50  ;;  %v436_v50 = vld [vmem:[#allocation2 + $0x3d0] sm:$0xff] }
  0x3c   :  { %285 = vmatpush1.msra.mxu0 %v80_v51  ;;  %v435_v51 = vld [vmem:[#allocation2 + $0x3c0] sm:$0xff] }
  0x3d   :  { %286 = vmatprep.subr.mxu0 %v79_v52  ;;  %v434_v52 = vld [vmem:[#allocation2 + $0x3b0] sm:$0xff] }
  0x3e   :  { %287 = vmatpush1.msra.mxu0 %v78_v53  ;;  %v433_v53 = vld [vmem:[#allocation2 + $0x3a0] sm:$0xff] }
  0x3f   :  { %288 = vmatprep.subr.mxu0 %v77_v54  ;;  %v432_v54 = vld [vmem:[#allocation2 + $0x390] sm:$0xff] }
  0x40   :  { %289 = vmatpush1.msra.mxu0 %v76_v55  ;;  %v431_v55 = vld [vmem:[#allocation2 + $0x380] sm:$0xff] }
  0x41   :  { %290 = vmatprep.subr.mxu0 %v75_v56  ;;  %v430_v56 = vld [vmem:[#allocation2 + $0x370] sm:$0xff] }
  0x42   :  { %291 = vmatpush1.msra.mxu0 %v74_v57  ;;  %v429_v57 = vld [vmem:[#allocation2 + $0x360] sm:$0xff] }
  0x43   :  { %292 = vmatprep.subr.mxu0 %v73_v58  ;;  %v428_v58 = vld [vmem:[#allocation2 + $0x350] sm:$0xff] }
  0x44   :  { %293 = vmatpush1.msra.mxu0 %v72_v59  ;;  %v427_v59 = vld [vmem:[#allocation2 + $0x340] sm:$0xff] }
  0x45   :  { %294 = vmatprep.subr.mxu0 %v71_v60  ;;  %v426_v60 = vld [vmem:[#allocation2 + $0x330] sm:$0xff] }
  0x46   :  { %295 = vmatpush1.msra.mxu0 %v70_v61  ;;  %v425_v61 = vld [vmem:[#allocation2 + $0x320] sm:$0xff] }
  0x47   :  { %296 = vmatprep.subr.mxu0 %v69_v62  ;;  %v424_v62 = vld [vmem:[#allocation2 + $0x310] sm:$0xff] }
  0x48   :  { %297 = vmatpush1.msra.mxu0 %v68_v63  ;;  %v423_v63 = vld [vmem:[#allocation2 + $0x300] sm:$0xff] }
  0x49   :  { %298 = vmatprep.subr.mxu0 %v67_v1 }
  0x4a   :  { %299 = vmatpush1.msra.mxu0 %v66_v2 }
  0x4b   :  { %300 = vmatprep.subr.mxu0 %v65_v22  ;;  %v442_v22 = vld [vmem:[#allocation2 + $0x338] sm:$0xff] }
  0x4c   :  { %301 = vmatpush1.msra.mxu0 %v64_v24  ;;  %v440_v24 = vld [vmem:[#allocation2 + $0x318] sm:$0xff] }
  0x4d   :  { %302 = vmatprep.subr.mxu0 %v63_v27  ;;  %v518_v27 = vld [vmem:[#allocation2 + $0x5f8] sm:$0xff] }
  0x4e   :  { %303 = vmatpush1.msra.mxu0 %v62_v29  ;;  %v485_v29 = vld [vmem:[#allocation2 + $0x4f0] sm:$0xff] }
  0x4f   :  { %1816 = vmatprep.subr.mxu0 %v2064_v0 }
  0xef   :  { %v192_v3 = vpop.f32.mrf.mxu0 }
  0xf0   :  { %vm196_vm2 = vcmp.gt.f32.partialorder %v192_v3, 0.0  ;;  %v197_v4 = vmul.f32 0.2, %v192_v3 }
  0xf1   :  { %v1780_v5 = vpop.f32.mrf.mxu0 }
  0xf2   :  { %v198_v7 = vsel %vm196_vm2, %v192_v3, %v197_v4  ;;  %v454_v4 = vld [vmem:[#allocation2 + $0x3f8] sm:$0xff]  ;;  %v453_v5 = vld [vmem:[#allocation2 + $0x3e8] sm:$0xff] }
  0xf3   :  { %1814 = vmatmul.mubr.f32.vlgmr.msra.gmra.mxu1 %v198_v7 }
  0xf4   :  { %344 = vmatpush1.msra.mxu1 %v124_v6  ;;  %407 = vmatprep.mubr.f32.mxu1 %v2064_v0  ;;  %v452_v6 = vld [vmem:[#allocation2 + $0x3d8] sm:$0xff] }
  0xf5   :  { %345 = vmatprep.subr.mxu1 %v123_v8  ;;  %v451_v8 = vld [vmem:[#allocation2 + $0x3c8] sm:$0xff] }
  0xf6   :  { %346 = vmatpush1.msra.mxu1 %v122_v9 }
  0xf7   :  { %347 = vmatprep.subr.mxu1 %v121_v10  ;;  %v450_v10 = vld [vmem:[#allocation2 + $0x3b8] sm:$0xff] }
  0xf8   :  { %348 = vmatpush1.msra.mxu1 %v120_v11 }
  0xf9   :  { %349 = vmatprep.subr.mxu1 %v119_v12 }
  0xfa   :  { %350 = vmatpush1.msra.mxu1 %v118_v13  ;;  %v449_v13 = vld [vmem:[#allocation2 + $0x3a8] sm:$0xff] }
  0xfb   :  { %351 = vmatprep.subr.mxu1 %v117_v14 }
  0xfc   :  { %352 = vmatpush1.msra.mxu1 %v116_v15 }
  0xfd   :  { %353 = vmatprep.subr.mxu1 %v115_v16  ;;  %v448_v16 = vld [vmem:[#allocation2 + $0x398] sm:$0xff] }
  0xfe   :  { %354 = vmatpush1.msra.mxu1 %v114_v17 }
  0xff   :  { %355 = vmatprep.subr.mxu1 %v113_v18  ;;  %v447_v18 = vld [vmem:[#allocation2 + $0x388] sm:$0xff] }
 0x100   :  { %356 = vmatpush1.msra.mxu1 %v112_v19  ;;  %v445_v19 = vld [vmem:[#allocation2 + $0x368] sm:$0xff] }
 0x101   :  { %357 = vmatprep.subr.mxu1 %v111_v20  ;;  %v444_v20 = vld [vmem:[#allocation2 + $0x358] sm:$0xff] }
 0x102   :  { %358 = vmatpush1.msra.mxu1 %v110_v21  ;;  %v443_v21 = vld [vmem:[#allocation2 + $0x348] sm:$0xff] }
 0x103   :  { %359 = vmatprep.subr.mxu1 %v109_v23  ;;  %v441_v23 = vld [vmem:[#allocation2 + $0x328] sm:$0xff] }
 0x104   :  { %360 = vmatpush1.msra.mxu1 %v108_v26  ;;  %v439_v26 = vld [vmem:[#allocation2 + $0x308] sm:$0xff] }
 0x105   :  { %361 = vmatprep.subr.mxu1 %v107_v28  ;;  %v486_v28 = vld [vmem:[#allocation2 + $0x4f8] sm:$0xff] }
 0x106   :  { %362 = vmatpush1.msra.mxu1 %v106_v30  ;;  %v484_v30 = vld [vmem:[#allocation2 + $0x4e8] sm:$0xff] }
 0x107   :  { %363 = vmatprep.subr.mxu1 %v105_v31  ;;  %v483_v31 = vld [vmem:[#allocation2 + $0x4e0] sm:$0xff] }
 0x108   :  { %364 = vmatpush1.msra.mxu1 %v104_v32  ;;  %v482_v32 = vld [vmem:[#allocation2 + $0x4d8] sm:$0xff] }
 0x109   :  { %365 = vmatprep.subr.mxu1 %v103_v34  ;;  %v481_v34 = vld [vmem:[#allocation2 + $0x4d0] sm:$0xff] }
 0x10a   :  { %366 = vmatpush1.msra.mxu1 %v102_v35  ;;  %v480_v35 = vld [vmem:[#allocation2 + $0x4c8] sm:$0xff] }
 0x10b   :  { %367 = vmatprep.subr.mxu1 %v101_v36  ;;  %v479_v36 = vld [vmem:[#allocation2 + $0x4c0] sm:$0xff] }
 0x10c   :  { %368 = vmatpush1.msra.mxu1 %v100_v37  ;;  %v478_v37 = vld [vmem:[#allocation2 + $0x4b8] sm:$0xff] }
 0x10d   :  { %369 = vmatprep.subr.mxu1 %v99_v38  ;;  %v477_v38 = vld [vmem:[#allocation2 + $0x4b0] sm:$0xff] }
 0x10e   :  { %370 = vmatpush1.msra.mxu1 %v98_v39  ;;  %v476_v39 = vld [vmem:[#allocation2 + $0x4a8] sm:$0xff] }
 0x10f   :  { %371 = vmatprep.subr.mxu1 %v97_v40  ;;  %v475_v40 = vld [vmem:[#allocation2 + $0x4a0] sm:$0xff] }
 0x110   :  { %372 = vmatpush1.msra.mxu1 %v96_v41  ;;  %v474_v41 = vld [vmem:[#allocation2 + $0x498] sm:$0xff] }
 0x111   :  { %373 = vmatprep.subr.mxu1 %v95_v42  ;;  %v473_v42 = vld [vmem:[#allocation2 + $0x490] sm:$0xff] }
 0x112   :  { %374 = vmatpush1.msra.mxu1 %v94_v43  ;;  %v472_v43 = vld [vmem:[#allocation2 + $0x488] sm:$0xff] }
 0x113   :  { %408 = vmatmul.mubr.f32.vlgmr.msra.gmra.mxu1 %v2121_v33  ;;  %1851 = vmatprep.subr.mxu1 %v2064_v0 }
 0x114   :  { %1883 = vmatprep.mubr.msk.f32.mxu1 %vm2065_vm0, %v2064_v0  ;;  %1852 = vmatpush3.msra.mxu1 %v454_v4  ;;  %v511_v4 = vld [vmem:[#allocation2 + $0x5c0] sm:$0xff] }
 0x115   :  { %1853 = vmatprep.subr.mxu1 %v2064_v0 }
 0x116   :  { %1854 = vmatpush3.msra.mxu1 %v453_v5  ;;  %v510_v5 = vld [vmem:[#allocation2 + $0x5b8] sm:$0xff] }
 0x117   :  { %1855 = vmatprep.subr.mxu1 %v2064_v0 }
 0x118   :  { %1856 = vmatpush3.msra.mxu1 %v452_v6  ;;  %v509_v6 = vld [vmem:[#allocation2 + $0x5b0] sm:$0xff] }
 0x119   :  { %1857 = vmatprep.subr.mxu1 %v2064_v0 }
 0x11a   :  { %1858 = vmatpush3.msra.mxu1 %v451_v8  ;;  %v507_v8 = vld [vmem:[#allocation2 + $0x5a0] sm:$0xff] }
 0x11b   :  { %1859 = vmatprep.subr.mxu1 %v2064_v0 }
 0x11c   :  { %1860 = vmatpush3.msra.mxu1 %v450_v10  ;;  %v505_v10 = vld [vmem:[#allocation2 + $0x590] sm:$0xff] }
 0x11d   :  { %1861 = vmatprep.subr.mxu1 %v2064_v0 }
 0x11e   :  { %1862 = vmatpush3.msra.mxu1 %v449_v13  ;;  %v502_v13 = vld [vmem:[#allocation2 + $0x578] sm:$0xff] }
 0x11f   :  { %1863 = vmatprep.subr.mxu1 %v2064_v0 }
 0x120   :  { %1864 = vmatpush3.msra.mxu1 %v448_v16  ;;  %v499_v16 = vld [vmem:[#allocation2 + $0x560] sm:$0xff] }
 0x121   :  { %1865 = vmatprep.subr.mxu1 %v2064_v0 }
 0x122   :  { %1866 = vmatpush3.msra.mxu1 %v447_v18  ;;  %v498_v18 = vld [vmem:[#allocation2 + $0x558] sm:$0xff] }
 0x123   :  { %1867 = vmatprep.subr.mxu1 %v2064_v0 }
 0x1b3   :  { %v265_v44 = vpop.f32.mrf.mxu1 }
 0x1b4   :  { %vm269_vm3 = vcmp.gt.f32.partialorder %v265_v44, 0.0  ;;  %v270_v45 = vmul.f32 0.2, %v265_v44 }
 0x1b5   :  { %v1815_v46 = vpop.f32.mrf.mxu1 }
 0x1b6   :  { %v271_v48 = vsel %vm269_vm3, %v265_v44, %v270_v45  ;;  %v471_v44 = vld [vmem:[#allocation2 + $0x480] sm:$0xff]  ;;  %v470_v45 = vld [vmem:[#allocation2 + $0x478] sm:$0xff]  ;;  %v469_v46 = vld [vmem:[#allocation2 + $0x470] sm:$0xff] }
 0x1b7   :  { %337 = vmatmul.mubr.f32.vlgmr.msra.gmra.mxu0 %v271_v48  ;;  %v467_v48 = vld [vmem:[#allocation2 + $0x460] sm:$0xff] }
 0x1b8   :  { %1817 = vmatpush3.msra.mxu0 %v438_v47  ;;  %1848 = vmatprep.mubr.msk.f32.mxu0 %vm2065_vm0, %v2064_v0  ;;  %v468_v47 = vld [vmem:[#allocation2 + $0x468] sm:$0xff] }
 0x1b9   :  { %1818 = vmatprep.subr.mxu0 %v2064_v0 }
 0x1ba   :  { %1819 = vmatpush3.msra.mxu0 %v437_v49  ;;  %v466_v49 = vld [vmem:[#allocation2 + $0x458] sm:$0xff] }
 0x1bb   :  { %1820 = vmatprep.subr.mxu0 %v2064_v0 }
 0x1bc   :  { %1821 = vmatpush3.msra.mxu0 %v436_v50  ;;  %v465_v50 = vld [vmem:[#allocation2 + $0x450] sm:$0xff] }
 0x1bd   :  { %1822 = vmatprep.subr.mxu0 %v2064_v0 }
 0x1be   :  { %1823 = vmatpush3.msra.mxu0 %v435_v51  ;;  %v464_v51 = vld [vmem:[#allocation2 + $0x448] sm:$0xff] }
 0x1bf   :  { %1824 = vmatprep.subr.mxu0 %v2064_v0 }
 0x1c0   :  { %1825 = vmatpush3.msra.mxu0 %v434_v52  ;;  %v463_v52 = vld [vmem:[#allocation2 + $0x440] sm:$0xff] }
 0x1c1   :  { %1826 = vmatprep.subr.mxu0 %v2064_v0 }
 0x1c2   :  { %1827 = vmatpush3.msra.mxu0 %v433_v53  ;;  %v462_v53 = vld [vmem:[#allocation2 + $0x438] sm:$0xff] }
 0x1c3   :  { %1828 = vmatprep.subr.mxu0 %v2064_v0 }
 0x1c4   :  { %1829 = vmatpush3.msra.mxu0 %v432_v54  ;;  %v461_v54 = vld [vmem:[#allocation2 + $0x430] sm:$0xff] }
 0x1c5   :  { %1830 = vmatprep.subr.mxu0 %v2064_v0 }
 0x1c6   :  { %1831 = vmatpush3.msra.mxu0 %v431_v55  ;;  %v460_v55 = vld [vmem:[#allocation2 + $0x428] sm:$0xff] }
 0x1c7   :  { %1832 = vmatprep.subr.mxu0 %v2064_v0 }
 0x1c8   :  { %1833 = vmatpush3.msra.mxu0 %v430_v56  ;;  %v459_v56 = vld [vmem:[#allocation2 + $0x420] sm:$0xff] }
 0x1c9   :  { %1834 = vmatprep.subr.mxu0 %v2064_v0 }
 0x1ca   :  { %1835 = vmatpush3.msra.mxu0 %v429_v57 }
 0x1cb   :  { %1836 = vmatprep.subr.mxu0 %v2064_v0 }
 0x1cc   :  { %1837 = vmatpush3.msra.mxu0 %v428_v58 }
 0x1cd   :  { %1838 = vmatprep.subr.mxu0 %v2064_v0 }
 0x1ce   :  { %1839 = vmatpush3.msra.mxu0 %v427_v59 }
 0x1cf   :  { %1840 = vmatprep.subr.mxu0 %v2064_v0 }
 0x1d0   :  { %1841 = vmatpush3.msra.mxu0 %v426_v60  ;;  %v517_v60 = vld [vmem:[#allocation2 + $0x5f0] sm:$0xff] }
 0x1d1   :  { %1842 = vmatprep.subr.mxu0 %v2064_v0 }
 0x1d2   :  { %1843 = vmatpush3.msra.mxu0 %v425_v61 }
 0x1d3   :  { %1844 = vmatprep.subr.mxu0 %v2064_v0  ;;  %v409_v3 = vpop.f32.mrf.mxu1 }
 0x1d4   :  { %1845 = vmatpush3.msra.mxu0 %v424_v62  ;;  %v516_v62 = vld [vmem:[#allocation2 + $0x5e8] sm:$0xff] }
 0x1d5   :  { %1846 = vmatprep.subr.mxu0 %v2064_v0  ;;  %v411_v7 = vpop.f32.mrf.mxu1 }
 0x1d6   :  { %1847 = vmatpush3.msra.mxu0 %v423_v63  ;;  %v414_v12 = vadd.f32 %v411_v7, %v2121_v33  ;;  %v446_v33 = vld [vmem:[#allocation2 + $0x378] sm:$0xff]  ;;  %v515_v63 = vld [vmem:[#allocation2 + $0x5e0] sm:$0xff]  ;;  %v508_v7 = vld [vmem:[#allocation2 + $0x5a8] sm:$0xff] }
 0x1d7   :  { %1868 = vmatpush3.msra.mxu1 %v446_v33  ;;  %665 = vmatprep.subr.mxu0 %v486_v28  ;;  %v497_v33 = vld [vmem:[#allocation2 + $0x550] sm:$0xff]  ;;  %v488_v28 = vld [vmem:[#allocation2 + $0x508] sm:$0xff] }
 0x1d8   :  { %1869 = vmatprep.subr.mxu1 %v2064_v0 }
 0x1d9   :  { %1870 = vmatpush3.msra.mxu1 %v445_v19  ;;  %v496_v19 = vld [vmem:[#allocation2 + $0x548] sm:$0xff] }
 0x1da   :  { %1871 = vmatprep.subr.mxu1 %v2064_v0 }
 0x1db   :  { %1872 = vmatpush3.msra.mxu1 %v444_v20  ;;  %v495_v20 = vld [vmem:[#allocation2 + $0x540] sm:$0xff] }
 0x1dc   :  { %1873 = vmatprep.subr.mxu1 %v2064_v0 }
 0x1dd   :  { %1874 = vmatpush3.msra.mxu1 %v443_v21  ;;  %v494_v21 = vld [vmem:[#allocation2 + $0x538] sm:$0xff] }
 0x1de   :  { %1875 = vmatprep.subr.mxu1 %v2064_v0 }
 0x1df   :  { %1876 = vmatpush3.msra.mxu1 %v442_v22  ;;  %v493_v22 = vld [vmem:[#allocation2 + $0x530] sm:$0xff] }
 0x1e0   :  { %1877 = vmatprep.subr.mxu1 %v2064_v0 }
 0x1e1   :  { %1878 = vmatpush3.msra.mxu1 %v441_v23  ;;  %v492_v23 = vld [vmem:[#allocation2 + $0x528] sm:$0xff] }
 0x1e2   :  { %1879 = vmatprep.subr.mxu1 %v2064_v0 }
 0x1e3   :  { %1880 = vmatpush3.msra.mxu1 %v440_v24  ;;  %v491_v24 = vld [vmem:[#allocation2 + $0x520] sm:$0xff] }
 0x1e4   :  { %1881 = vmatprep.subr.mxu1 %v2064_v0 }
 0x1e5   :  { %1882 = vmatpush3.msra.mxu1 %v439_v26  ;;  %v490_v26 = vld [vmem:[#allocation2 + $0x518] sm:$0xff] }
 0x1e6   :  { %736 = vmatprep.subr.mxu1 %v518_v27  ;;  %v489_v27 = vld [vmem:[#allocation2 + $0x510] sm:$0xff] }
 0x277   :  { %v338_v1 = vpop.f32.mrf.mxu0 }
 0x278   :  { %v415_v2 = vmul.f32 1.442695, %v338_v1  ;;  %420 = vadd.xlane.f32.xlu0 %v338_v1  ;;  %v514_v1 = vld [vmem:[#allocation2 + $0x5d8] sm:$0xff] }
 0x279   :  { %v340_v15 = vpop.f32.mrf.mxu0 }
 0x27a   :  { %2031 = vpow2.f32 %v415_v2  ;;  %v513_v2 = vld [vmem:[#allocation2 + $0x5d0] sm:$0xff] }
 0x287   :  { %v2032_v9 = vpop.eup %2031 }
 0x288   :  { %v417_v11 = vmul.f32 %v2032_v9, %v409_v3  ;;  %v512_v3 = vld [vmem:[#allocation2 + $0x5c8] sm:$0xff]  ;;  %v506_v9 = vld [vmem:[#allocation2 + $0x598] sm:$0xff] }
 0x28a   :  { %v418_v14 = vadd.f32 %v417_v11, %v414_v12  ;;  %v504_v11 = vld [vmem:[#allocation2 + $0x588] sm:$0xff]  ;;  %v503_v12 = vld [vmem:[#allocation2 + $0x580] sm:$0xff] }
 0x28c   :  { %v2159_v17 = vadd.f32 %v418_v14, %v340_v15  ;;  %v501_v14 = vld [vmem:[#allocation2 + $0x570] sm:$0xff]  ;;  %v500_v15 = vld [vmem:[#allocation2 + $0x568] sm:$0xff] }
 0x28e   :  { %1849 = vmatmul.mubr.f32.vlgmr.msra.gmra.mxu0 %v2159_v17 }
 0x28f   :  { %729 = vmatprep.mubr.f32.mxu0 %v2064_v0  ;;  %666 = vmatpush1.msra.mxu0 %v485_v29  ;;  %v487_v29 = vld [vmem:[#allocation2 + $0x500] sm:$0xff] }
 0x290   :  { %667 = vmatprep.subr.mxu0 %v484_v30  ;;  %v458_v30 = vld [vmem:[#allocation2 + $0x418] sm:$0xff] }
 0x291   :  { %668 = vmatpush1.msra.mxu0 %v483_v31  ;;  %v457_v31 = vld [vmem:[#allocation2 + $0x410] sm:$0xff] }
 0x292   :  { %669 = vmatprep.subr.mxu0 %v482_v32  ;;  %v456_v32 = vld [vmem:[#allocation2 + $0x408] sm:$0xff] }
 0x293   :  { %670 = vmatpush1.msra.mxu0 %v481_v34  ;;  %v455_v34 = vld [vmem:[#allocation2 + $0x400] sm:$0xff] }
 0x294   :  { %671 = vmatprep.subr.mxu0 %v480_v35 }
 0x295   :  { %672 = vmatpush1.msra.mxu0 %v479_v36 }
 0x296   :  { %673 = vmatprep.subr.mxu0 %v478_v37 }
 0x297   :  { %674 = vmatpush1.msra.mxu0 %v477_v38  ;;  %v831_v38 = vld [vmem:[#allocation2 + $0x6f0] sm:$0xff] }
 0x298   :  { %675 = vmatprep.subr.mxu0 %v476_v39 }
 0x299   :  { %676 = vmatpush1.msra.mxu0 %v475_v40  ;;  %v830_v40 = vld [vmem:[#allocation2 + $0x6e0] sm:$0xff] }
 0x29a   :  { %677 = vmatprep.subr.mxu0 %v474_v41  ;;  %v829_v41 = vld [vmem:[#allocation2 + $0x6d0] sm:$0xff] }
 0x29b   :  { %678 = vmatpush1.msra.mxu0 %v473_v42  ;;  %v828_v42 = vld [vmem:[#allocation2 + $0x6c0] sm:$0xff] }
 0x29c   :  { %679 = vmatprep.subr.mxu0 %v472_v43  ;;  %v827_v43 = vld [vmem:[#allocation2 + $0x6b0] sm:$0xff] }
 0x29d   :  { %680 = vmatpush1.msra.mxu0 %v471_v44  ;;  %v826_v44 = vld [vmem:[#allocation2 + $0x6a0] sm:$0xff] }
 0x29e   :  { %681 = vmatprep.subr.mxu0 %v470_v45  ;;  %v825_v45 = vld [vmem:[#allocation2 + $0x690] sm:$0xff] }
 0x29f   :  { %682 = vmatpush1.msra.mxu0 %v469_v46  ;;  %v824_v46 = vld [vmem:[#allocation2 + $0x680] sm:$0xff] }
 0x2a0   :  { %683 = vmatprep.subr.mxu0 %v468_v47  ;;  %v823_v47 = vld [vmem:[#allocation2 + $0x670] sm:$0xff] }
 0x2a1   :  { %684 = vmatpush1.msra.mxu0 %v467_v48  ;;  %v822_v48 = vld [vmem:[#allocation2 + $0x660] sm:$0xff] }
 0x2a2   :  { %685 = vmatprep.subr.mxu0 %v466_v49  ;;  %v821_v49 = vld [vmem:[#allocation2 + $0x650] sm:$0xff] }
 0x2a3   :  { %686 = vmatpush1.msra.mxu0 %v465_v50  ;;  %v820_v50 = vld [vmem:[#allocation2 + $0x640] sm:$0xff] }
 0x2a4   :  { %687 = vmatprep.subr.mxu0 %v464_v51  ;;  %v819_v51 = vld [vmem:[#allocation2 + $0x630] sm:$0xff] }
 0x2a5   :  { %688 = vmatpush1.msra.mxu0 %v463_v52  ;;  %v818_v52 = vld [vmem:[#allocation2 + $0x620] sm:$0xff] }
 0x2a6   :  { %689 = vmatprep.subr.mxu0 %v462_v53  ;;  %v817_v53 = vld [vmem:[#allocation2 + $0x610] sm:$0xff] }
 0x2a7   :  { %690 = vmatpush1.msra.mxu0 %v461_v54  ;;  %v816_v54 = vld [vmem:[#allocation2 + $0x600] sm:$0xff] }
 0x2a8   :  { %691 = vmatprep.subr.mxu0 %v460_v55 }
 0x2a9   :  { %692 = vmatpush1.msra.mxu0 %v459_v56 }
 0x2aa   :  { %693 = vmatprep.subr.mxu0 %v458_v30  ;;  %v868_v30 = vld [vmem:[#allocation2 + $0x7a0] sm:$0xff] }
 0x2ab   :  { %694 = vmatpush1.msra.mxu0 %v457_v31  ;;  %v867_v31 = vld [vmem:[#allocation2 + $0x798] sm:$0xff] }
 0x2ac   :  { %695 = vmatprep.subr.mxu0 %v456_v32  ;;  %v866_v32 = vld [vmem:[#allocation2 + $0x790] sm:$0xff] }
 0x2ad   :  { %696 = vmatpush1.msra.mxu0 %v455_v34  ;;  %v865_v34 = vld [vmem:[#allocation2 + $0x788] sm:$0xff] }
 0x2ae   :  { %1886 = vmatprep.subr.mxu0 %v2064_v0 }
 0x34e   :  { %v585_v57 = vpop.f32.mrf.mxu0 }
 0x34f   :  { %vm589_vm4 = vcmp.gt.f32.partialorder %v585_v57, 0.0  ;;  %v590_v58 = vmul.f32 0.2, %v585_v57 }
 0x350   :  { %v1850_v59 = vpop.f32.mrf.mxu0 }
 0x351   :  { %v591_v61 = vsel %vm589_vm4, %v585_v57, %v590_v58  ;;  %v847_v58 = vld [vmem:[#allocation2 + $0x6f8] sm:$0xff]  ;;  %v846_v59 = vld [vmem:[#allocation2 + $0x6e8] sm:$0xff] }
 0x352   :  { %1884 = vmatmul.mubr.f32.vlgmr.msra.gmra.mxu1 %v591_v61 }
 0x353   :  { %737 = vmatpush1.msra.mxu1 %v517_v60  ;;  %800 = vmatprep.mubr.f32.mxu1 %v2064_v0  ;;  %v845_v60 = vld [vmem:[#allocation2 + $0x6d8] sm:$0xff] }
 0x354   :  { %738 = vmatprep.subr.mxu1 %v516_v62  ;;  %v844_v62 = vld [vmem:[#allocation2 + $0x6c8] sm:$0xff] }
 0x355   :  { %739 = vmatpush1.msra.mxu1 %v515_v63 }
 0x356   :  { %740 = vmatprep.subr.mxu1 %v514_v1 }
 0x357   :  { %741 = vmatpush1.msra.mxu1 %v513_v2 }
 0x358   :  { %742 = vmatprep.subr.mxu1 %v512_v3  ;;  %v843_v3 = vld [vmem:[#allocation2 + $0x6b8] sm:$0xff] }
 0x359   :  { %743 = vmatpush1.msra.mxu1 %v511_v4 }
 0x35a   :  { %744 = vmatprep.subr.mxu1 %v510_v5  ;;  %v842_v5 = vld [vmem:[#allocation2 + $0x6a8] sm:$0xff] }
 0x35b   :  { %745 = vmatpush1.msra.mxu1 %v509_v6 }
 0x35c   :  { %746 = vmatprep.subr.mxu1 %v508_v7 }
 0x35d   :  { %747 = vmatpush1.msra.mxu1 %v507_v8  ;;  %v841_v8 = vld [vmem:[#allocation2 + $0x698] sm:$0xff] }
 0x35e   :  { %748 = vmatprep.subr.mxu1 %v506_v9  ;;  %v839_v9 = vld [vmem:[#allocation2 + $0x678] sm:$0xff] }
 0x35f   :  { %749 = vmatpush1.msra.mxu1 %v505_v10  ;;  %v838_v10 = vld [vmem:[#allocation2 + $0x668] sm:$0xff] }
 0x360   :  { %750 = vmatprep.subr.mxu1 %v504_v11  ;;  %v837_v11 = vld [vmem:[#allocation2 + $0x658] sm:$0xff] }
 0x361   :  { %751 = vmatpush1.msra.mxu1 %v503_v12  ;;  %v836_v12 = vld [vmem:[#allocation2 + $0x648] sm:$0xff] }
 0x362   :  { %752 = vmatprep.subr.mxu1 %v502_v13  ;;  %v835_v13 = vld [vmem:[#allocation2 + $0x638] sm:$0xff] }
 0x363   :  { %753 = vmatpush1.msra.mxu1 %v501_v14  ;;  %v834_v14 = vld [vmem:[#allocation2 + $0x628] sm:$0xff] }
 0x364   :  { %754 = vmatprep.subr.mxu1 %v500_v15  ;;  %v833_v15 = vld [vmem:[#allocation2 + $0x618] sm:$0xff] }
 0x365   :  { %755 = vmatpush1.msra.mxu1 %v499_v16  ;;  %v832_v16 = vld [vmem:[#allocation2 + $0x608] sm:$0xff] }
 0x366   :  { %756 = vmatprep.subr.mxu1 %v498_v18  ;;  %v911_v18 = vld [vmem:[#allocation2 + $0x8f8] sm:$0xff] }
 0x367   :  { %757 = vmatpush1.msra.mxu1 %v497_v33  ;;  %v879_v33 = vld [vmem:[#allocation2 + $0x7f8] sm:$0xff] }
 0x368   :  { %758 = vmatprep.subr.mxu1 %v496_v19  ;;  %v878_v19 = vld [vmem:[#allocation2 + $0x7f0] sm:$0xff] }
 0x369   :  { %759 = vmatpush1.msra.mxu1 %v495_v20  ;;  %v877_v20 = vld [vmem:[#allocation2 + $0x7e8] sm:$0xff] }
 0x36a   :  { %760 = vmatprep.subr.mxu1 %v494_v21  ;;  %v876_v21 = vld [vmem:[#allocation2 + $0x7e0] sm:$0xff] }
 0x36b   :  { %761 = vmatpush1.msra.mxu1 %v493_v22  ;;  %v875_v22 = vld [vmem:[#allocation2 + $0x7d8] sm:$0xff] }
 0x36c   :  { %762 = vmatprep.subr.mxu1 %v492_v23  ;;  %v874_v23 = vld [vmem:[#allocation2 + $0x7d0] sm:$0xff] }
 0x36d   :  { %763 = vmatpush1.msra.mxu1 %v491_v24  ;;  %v873_v24 = vld [vmem:[#allocation2 + $0x7c8] sm:$0xff] }
 0x36e   :  { %764 = vmatprep.subr.mxu1 %v490_v26  ;;  %v872_v26 = vld [vmem:[#allocation2 + $0x7c0] sm:$0xff] }
 0x36f   :  { %765 = vmatpush1.msra.mxu1 %v489_v27  ;;  %v871_v27 = vld [vmem:[#allocation2 + $0x7b8] sm:$0xff] }
 0x370   :  { %766 = vmatprep.subr.mxu1 %v488_v28  ;;  %v870_v28 = vld [vmem:[#allocation2 + $0x7b0] sm:$0xff] }
 0x371   :  { %767 = vmatpush1.msra.mxu1 %v487_v29  ;;  %v869_v29 = vld [vmem:[#allocation2 + $0x7a8] sm:$0xff] }
 0x372   :  { %801 = vmatmul.mubr.f32.vlgmr.msra.gmra.mxu1 %v2159_v17  ;;  %1921 = vmatprep.subr.mxu1 %v2064_v0 }
 0x373   :  { %1953 = vmatprep.mubr.msk.f32.mxu1 %vm2065_vm0, %v2064_v0  ;;  %1922 = vmatpush3.msra.mxu1 %v847_v58  ;;  %v904_v58 = vld [vmem:[#allocation2 + $0x8c0] sm:$0xff] }
 0x374   :  { %1923 = vmatprep.subr.mxu1 %v2064_v0 }
 0x375   :  { %1924 = vmatpush3.msra.mxu1 %v846_v59  ;;  %v903_v59 = vld [vmem:[#allocation2 + $0x8b8] sm:$0xff] }
 0x376   :  { %1925 = vmatprep.subr.mxu1 %v2064_v0 }
 0x377   :  { %1926 = vmatpush3.msra.mxu1 %v845_v60  ;;  %v902_v60 = vld [vmem:[#allocation2 + $0x8b0] sm:$0xff] }
 0x378   :  { %1927 = vmatprep.subr.mxu1 %v2064_v0 }
 0x379   :  { %1928 = vmatpush3.msra.mxu1 %v844_v62  ;;  %v900_v62 = vld [vmem:[#allocation2 + $0x8a0] sm:$0xff] }
 0x37a   :  { %1929 = vmatprep.subr.mxu1 %v2064_v0 }
 0x37b   :  { %1930 = vmatpush3.msra.mxu1 %v843_v3  ;;  %v896_v3 = vld [vmem:[#allocation2 + $0x880] sm:$0xff] }
 0x37c   :  { %1931 = vmatprep.subr.mxu1 %v2064_v0 }
 0x37d   :  { %1932 = vmatpush3.msra.mxu1 %v842_v5  ;;  %v894_v5 = vld [vmem:[#allocation2 + $0x870] sm:$0xff] }
 0x37e   :  { %1933 = vmatprep.subr.mxu1 %v2064_v0 }
 0x37f   :  { %1934 = vmatpush3.msra.mxu1 %v841_v8  ;;  %v892_v8 = vld [vmem:[#allocation2 + $0x860] sm:$0xff] }
 0x380   :  { %1935 = vmatprep.subr.mxu1 %v2064_v0 }
 0x412   :  { %v658_v35 = vpop.f32.mrf.mxu1 }
 0x413   :  { %vm662_vm5 = vcmp.gt.f32.partialorder %v658_v35, 0.0  ;;  %v663_v36 = vmul.f32 0.2, %v658_v35 }
 0x414   :  { %v1885_v37 = vpop.f32.mrf.mxu1 }
 0x415   :  { %v664_v39 = vsel %vm662_vm5, %v658_v35, %v663_v36  ;;  %v864_v35 = vld [vmem:[#allocation2 + $0x780] sm:$0xff]  ;;  %v863_v36 = vld [vmem:[#allocation2 + $0x778] sm:$0xff]  ;;  %v862_v37 = vld [vmem:[#allocation2 + $0x770] sm:$0xff] }
 0x416   :  { %730 = vmatmul.mubr.f32.vlgmr.msra.gmra.mxu0 %v664_v39  ;;  %v860_v39 = vld [vmem:[#allocation2 + $0x760] sm:$0xff] }
 0x417   :  { %1887 = vmatpush3.msra.mxu0 %v831_v38  ;;  %1918 = vmatprep.mubr.msk.f32.mxu0 %vm2065_vm0, %v2064_v0  ;;  %v861_v38 = vld [vmem:[#allocation2 + $0x768] sm:$0xff] }
 0x418   :  { %1888 = vmatprep.subr.mxu0 %v2064_v0 }
 0x419   :  { %1889 = vmatpush3.msra.mxu0 %v830_v40  ;;  %v859_v40 = vld [vmem:[#allocation2 + $0x758] sm:$0xff] }
 0x41a   :  { %1890 = vmatprep.subr.mxu0 %v2064_v0 }
 0x41b   :  { %1891 = vmatpush3.msra.mxu0 %v829_v41  ;;  %v858_v41 = vld [vmem:[#allocation2 + $0x750] sm:$0xff] }
 0x41c   :  { %1892 = vmatprep.subr.mxu0 %v2064_v0 }
 0x41d   :  { %1893 = vmatpush3.msra.mxu0 %v828_v42  ;;  %v857_v42 = vld [vmem:[#allocation2 + $0x748] sm:$0xff] }
 0x41e   :  { %1894 = vmatprep.subr.mxu0 %v2064_v0 }
 0x41f   :  { %1895 = vmatpush3.msra.mxu0 %v827_v43  ;;  %v856_v43 = vld [vmem:[#allocation2 + $0x740] sm:$0xff] }
 0x420   :  { %1896 = vmatprep.subr.mxu0 %v2064_v0 }
 0x421   :  { %1897 = vmatpush3.msra.mxu0 %v826_v44  ;;  %v855_v44 = vld [vmem:[#allocation2 + $0x738] sm:$0xff] }
 0x422   :  { %1898 = vmatprep.subr.mxu0 %v2064_v0 }
 0x423   :  { %1899 = vmatpush3.msra.mxu0 %v825_v45  ;;  %v854_v45 = vld [vmem:[#allocation2 + $0x730] sm:$0xff] }
 0x424   :  { %1900 = vmatprep.subr.mxu0 %v2064_v0 }
 0x425   :  { %1901 = vmatpush3.msra.mxu0 %v824_v46  ;;  %v853_v46 = vld [vmem:[#allocation2 + $0x728] sm:$0xff] }
 0x426   :  { %1902 = vmatprep.subr.mxu0 %v2064_v0 }
 0x427   :  { %1903 = vmatpush3.msra.mxu0 %v823_v47  ;;  %v852_v47 = vld [vmem:[#allocation2 + $0x720] sm:$0xff] }
 0x428   :  { %1904 = vmatprep.subr.mxu0 %v2064_v0 }
 0x429   :  { %1905 = vmatpush3.msra.mxu0 %v822_v48 }
 0x42a   :  { %1906 = vmatprep.subr.mxu0 %v2064_v0 }
 0x42b   :  { %1907 = vmatpush3.msra.mxu0 %v821_v49 }
 0x42c   :  { %1908 = vmatprep.subr.mxu0 %v2064_v0 }
 0x42d   :  { %1909 = vmatpush3.msra.mxu0 %v820_v50 }
 0x42e   :  { %1910 = vmatprep.subr.mxu0 %v2064_v0 }
 0x42f   :  { %1911 = vmatpush3.msra.mxu0 %v819_v51  ;;  %v910_v51 = vld [vmem:[#allocation2 + $0x8f0] sm:$0xff] }
 0x430   :  { %1912 = vmatprep.subr.mxu0 %v2064_v0 }
 0x431   :  { %1913 = vmatpush3.msra.mxu0 %v818_v52 }
 0x432   :  { %1914 = vmatprep.subr.mxu0 %v2064_v0  ;;  %v802_v57 = vpop.f32.mrf.mxu1 }
 0x433   :  { %1915 = vmatpush3.msra.mxu0 %v817_v53  ;;  %v909_v53 = vld [vmem:[#allocation2 + $0x8e8] sm:$0xff] }
 0x434   :  { %1916 = vmatprep.subr.mxu0 %v2064_v0  ;;  %v804_v61 = vpop.f32.mrf.mxu1 }
 0x435   :  { %1917 = vmatpush3.msra.mxu0 %v816_v54  ;;  %v807_v1 = vadd.f32 %v804_v61, %v2159_v17  ;;  %v840_v17 = vld [vmem:[#allocation2 + $0x688] sm:$0xff]  ;;  %v908_v54 = vld [vmem:[#allocation2 + $0x8e0] sm:$0xff] }
 0x436   :  { %1936 = vmatpush3.msra.mxu1 %v840_v17  ;;  %1058 = vmatprep.subr.mxu0 %v879_v33  ;;  %v901_v61 = vld [vmem:[#allocation2 + $0x8a8] sm:$0xff]  ;;  %v891_v17 = vld [vmem:[#allocation2 + $0x858] sm:$0xff] }
 0x437   :  { %1937 = vmatprep.subr.mxu1 %v2064_v0  ;;  %v881_v33 = vld [vmem:[#allocation2 + $0x808] sm:$0xff] }
 0x438   :  { %1938 = vmatpush3.msra.mxu1 %v839_v9  ;;  %v890_v9 = vld [vmem:[#allocation2 + $0x850] sm:$0xff] }
 0x439   :  { %1939 = vmatprep.subr.mxu1 %v2064_v0 }
 0x43a   :  { %1940 = vmatpush3.msra.mxu1 %v838_v10  ;;  %v889_v10 = vld [vmem:[#allocation2 + $0x848] sm:$0xff] }
 0x43b   :  { %1941 = vmatprep.subr.mxu1 %v2064_v0 }
 0x43c   :  { %1942 = vmatpush3.msra.mxu1 %v837_v11  ;;  %v888_v11 = vld [vmem:[#allocation2 + $0x840] sm:$0xff] }
 0x43d   :  { %1943 = vmatprep.subr.mxu1 %v2064_v0 }
 0x43e   :  { %1944 = vmatpush3.msra.mxu1 %v836_v12  ;;  %v887_v12 = vld [vmem:[#allocation2 + $0x838] sm:$0xff] }
 0x43f   :  { %1945 = vmatprep.subr.mxu1 %v2064_v0 }
 0x440   :  { %1946 = vmatpush3.msra.mxu1 %v835_v13  ;;  %v886_v13 = vld [vmem:[#allocation2 + $0x830] sm:$0xff] }
 0x441   :  { %1947 = vmatprep.subr.mxu1 %v2064_v0 }
 0x442   :  { %1948 = vmatpush3.msra.mxu1 %v834_v14  ;;  %v885_v14 = vld [vmem:[#allocation2 + $0x828] sm:$0xff] }
 0x443   :  { %1949 = vmatprep.subr.mxu1 %v2064_v0 }
 0x444   :  { %1950 = vmatpush3.msra.mxu1 %v833_v15  ;;  %v884_v15 = vld [vmem:[#allocation2 + $0x820] sm:$0xff] }
 0x445   :  { %1951 = vmatprep.subr.mxu1 %v2064_v0 }
 0x446   :  { %1952 = vmatpush3.msra.mxu1 %v832_v16  ;;  %v883_v16 = vld [vmem:[#allocation2 + $0x818] sm:$0xff] }
 0x447   :  { %1129 = vmatprep.subr.mxu1 %v911_v18  ;;  %v882_v18 = vld [vmem:[#allocation2 + $0x810] sm:$0xff] }
 0x4d6   :  { %v731_v55 = vpop.f32.mrf.mxu0 }
 0x4d7   :  { %v808_v56 = vmul.f32 1.442695, %v731_v55  ;;  %813 = vadd.xlane.f32.xlu0 %v731_v55  ;;  %v907_v55 = vld [vmem:[#allocation2 + $0x8d8] sm:$0xff] }
 0x4d8   :  { %v733_v6 = vpop.f32.mrf.mxu0 }
 0x4d9   :  { %2033 = vpow2.f32 %v808_v56  ;;  %v906_v56 = vld [vmem:[#allocation2 + $0x8d0] sm:$0xff] }
 0x4e6   :  { %v2034_v63 = vpop.eup %2033 }
 0x4e7   :  { %v810_v2 = vmul.f32 %v2034_v63, %v802_v57  ;;  %v905_v57 = vld [vmem:[#allocation2 + $0x8c8] sm:$0xff]  ;;  %v899_v63 = vld [vmem:[#allocation2 + $0x898] sm:$0xff] }
 0x4e9   :  { %v811_v4 = vadd.f32 %v810_v2, %v807_v1  ;;  %v898_v1 = vld [vmem:[#allocation2 + $0x890] sm:$0xff]  ;;  %v897_v2 = vld [vmem:[#allocation2 + $0x888] sm:$0xff] }
 0x4eb   :  { %v2201_v7 = vadd.f32 %v811_v4, %v733_v6  ;;  %v895_v4 = vld [vmem:[#allocation2 + $0x878] sm:$0xff]  ;;  %v893_v6 = vld [vmem:[#allocation2 + $0x868] sm:$0xff] }
 0x4ed   :  { %1919 = vmatmul.mubr.f32.vlgmr.msra.gmra.mxu0 %v2201_v7 }
 0x4ee   :  { %1122 = vmatprep.mubr.f32.mxu0 %v2064_v0  ;;  %1059 = vmatpush1.msra.mxu0 %v878_v19  ;;  %v880_v19 = vld [vmem:[#allocation2 + $0x800] sm:$0xff] }
 0x4ef   :  { %1060 = vmatprep.subr.mxu0 %v877_v20  ;;  %v851_v20 = vld [vmem:[#allocation2 + $0x718] sm:$0xff] }
 0x4f0   :  { %1061 = vmatpush1.msra.mxu0 %v876_v21  ;;  %v850_v21 = vld [vmem:[#allocation2 + $0x710] sm:$0xff] }
 0x4f1   :  { %1062 = vmatprep.subr.mxu0 %v875_v22  ;;  %v849_v22 = vld [vmem:[#allocation2 + $0x708] sm:$0xff] }
 0x4f2   :  { %1063 = vmatpush1.msra.mxu0 %v874_v23  ;;  %v848_v23 = vld [vmem:[#allocation2 + $0x700] sm:$0xff] }
 0x4f3   :  { %1064 = vmatprep.subr.mxu0 %v873_v24 }
 0x4f4   :  { %1065 = vmatpush1.msra.mxu0 %v872_v26 }
 0x4f5   :  { %1066 = vmatprep.subr.mxu0 %v871_v27 }
 0x4f6   :  { %1067 = vmatpush1.msra.mxu0 %v870_v28  ;;  %v1224_v28 = vld [vmem:[#allocation2 + $0x9f0] sm:$0xff] }
 0x4f7   :  { %1068 = vmatprep.subr.mxu0 %v869_v29 }
 0x4f8   :  { %1069 = vmatpush1.msra.mxu0 %v868_v30  ;;  %v1223_v30 = vld [vmem:[#allocation2 + $0x9e0] sm:$0xff] }
 0x4f9   :  { %1070 = vmatprep.subr.mxu0 %v867_v31  ;;  %v1222_v31 = vld [vmem:[#allocation2 + $0x9d0] sm:$0xff] }
 0x4fa   :  { %1071 = vmatpush1.msra.mxu0 %v866_v32  ;;  %v1221_v32 = vld [vmem:[#allocation2 + $0x9c0] sm:$0xff] }
 0x4fb   :  { %1072 = vmatprep.subr.mxu0 %v865_v34  ;;  %v1220_v34 = vld [vmem:[#allocation2 + $0x9b0] sm:$0xff] }
 0x4fc   :  { %1073 = vmatpush1.msra.mxu0 %v864_v35  ;;  %v1219_v35 = vld [vmem:[#allocation2 + $0x9a0] sm:$0xff] }
 0x4fd   :  { %1074 = vmatprep.subr.mxu0 %v863_v36  ;;  %v1218_v36 = vld [vmem:[#allocation2 + $0x990] sm:$0xff] }
 0x4fe   :  { %1075 = vmatpush1.msra.mxu0 %v862_v37  ;;  %v1217_v37 = vld [vmem:[#allocation2 + $0x980] sm:$0xff] }
 0x4ff   :  { %1076 = vmatprep.subr.mxu0 %v861_v38  ;;  %v1216_v38 = vld [vmem:[#allocation2 + $0x970] sm:$0xff] }
 0x500   :  { %1077 = vmatpush1.msra.mxu0 %v860_v39  ;;  %v1215_v39 = vld [vmem:[#allocation2 + $0x960] sm:$0xff] }
 0x501   :  { %1078 = vmatprep.subr.mxu0 %v859_v40  ;;  %v1214_v40 = vld [vmem:[#allocation2 + $0x950] sm:$0xff] }
 0x502   :  { %1079 = vmatpush1.msra.mxu0 %v858_v41  ;;  %v1213_v41 = vld [vmem:[#allocation2 + $0x940] sm:$0xff] }
 0x503   :  { %1080 = vmatprep.subr.mxu0 %v857_v42  ;;  %v1212_v42 = vld [vmem:[#allocation2 + $0x930] sm:$0xff] }
 0x504   :  { %1081 = vmatpush1.msra.mxu0 %v856_v43  ;;  %v1211_v43 = vld [vmem:[#allocation2 + $0x920] sm:$0xff] }
 0x505   :  { %1082 = vmatprep.subr.mxu0 %v855_v44  ;;  %v1210_v44 = vld [vmem:[#allocation2 + $0x910] sm:$0xff] }
 0x506   :  { %1083 = vmatpush1.msra.mxu0 %v854_v45  ;;  %v1209_v45 = vld [vmem:[#allocation2 + $0x900] sm:$0xff] }
 0x507   :  { %1084 = vmatprep.subr.mxu0 %v853_v46 }
 0x508   :  { %1085 = vmatpush1.msra.mxu0 %v852_v47 }
 0x509   :  { %1086 = vmatprep.subr.mxu0 %v851_v20  ;;  %v1261_v20 = vld [vmem:[#allocation2 + $0xaa0] sm:$0xff] }
 0x50a   :  { %1087 = vmatpush1.msra.mxu0 %v850_v21  ;;  %v1260_v21 = vld [vmem:[#allocation2 + $0xa98] sm:$0xff] }
 0x50b   :  { %1088 = vmatprep.subr.mxu0 %v849_v22  ;;  %v1259_v22 = vld [vmem:[#allocation2 + $0xa90] sm:$0xff] }
 0x50c   :  { %1089 = vmatpush1.msra.mxu0 %v848_v23  ;;  %v1258_v23 = vld [vmem:[#allocation2 + $0xa88] sm:$0xff] }
 0x50d   :  { %1956 = vmatprep.subr.mxu0 %v2064_v0 }
 0x5ad   :  { %v978_v48 = vpop.f32.mrf.mxu0 }
 0x5ae   :  { %vm982_vm6 = vcmp.gt.f32.partialorder %v978_v48, 0.0  ;;  %v983_v49 = vmul.f32 0.2, %v978_v48 }
 0x5af   :  { %v1920_v50 = vpop.f32.mrf.mxu0 }
 0x5b0   :  { %v984_v52 = vsel %vm982_vm6, %v978_v48, %v983_v49  ;;  %v1240_v49 = vld [vmem:[#allocation2 + $0x9f8] sm:$0xff]  ;;  %v1239_v50 = vld [vmem:[#allocation2 + $0x9e8] sm:$0xff] }
 0x5b1   :  { %1954 = vmatmul.mubr.f32.vlgmr.msra.gmra.mxu1 %v984_v52 }
 0x5b2   :  { %1130 = vmatpush1.msra.mxu1 %v910_v51  ;;  %1193 = vmatprep.mubr.f32.mxu1 %v2064_v0  ;;  %v1238_v51 = vld [vmem:[#allocation2 + $0x9d8] sm:$0xff] }
 0x5b3   :  { %1131 = vmatprep.subr.mxu1 %v909_v53  ;;  %v1237_v53 = vld [vmem:[#allocation2 + $0x9c8] sm:$0xff] }
 0x5b4   :  { %1132 = vmatpush1.msra.mxu1 %v908_v54 }
 0x5b5   :  { %1133 = vmatprep.subr.mxu1 %v907_v55 }
 0x5b6   :  { %1134 = vmatpush1.msra.mxu1 %v906_v56 }
 0x5b7   :  { %1135 = vmatprep.subr.mxu1 %v905_v57  ;;  %v1236_v57 = vld [vmem:[#allocation2 + $0x9b8] sm:$0xff] }
 0x5b8   :  { %1136 = vmatpush1.msra.mxu1 %v904_v58 }
 0x5b9   :  { %1137 = vmatprep.subr.mxu1 %v903_v59  ;;  %v1235_v59 = vld [vmem:[#allocation2 + $0x9a8] sm:$0xff] }
 0x5ba   :  { %1138 = vmatpush1.msra.mxu1 %v902_v60 }
 0x5bb   :  { %1139 = vmatprep.subr.mxu1 %v901_v61 }
 0x5bc   :  { %1140 = vmatpush1.msra.mxu1 %v900_v62  ;;  %v1234_v62 = vld [vmem:[#allocation2 + $0x998] sm:$0xff] }
 0x5bd   :  { %1141 = vmatprep.subr.mxu1 %v899_v63  ;;  %v1232_v63 = vld [vmem:[#allocation2 + $0x978] sm:$0xff] }
 0x5be   :  { %1142 = vmatpush1.msra.mxu1 %v898_v1  ;;  %v1231_v1 = vld [vmem:[#allocation2 + $0x968] sm:$0xff] }
 0x5bf   :  { %1143 = vmatprep.subr.mxu1 %v897_v2  ;;  %v1230_v2 = vld [vmem:[#allocation2 + $0x958] sm:$0xff] }
 0x5c0   :  { %1144 = vmatpush1.msra.mxu1 %v896_v3  ;;  %v1229_v3 = vld [vmem:[#allocation2 + $0x948] sm:$0xff] }
 0x5c1   :  { %1145 = vmatprep.subr.mxu1 %v895_v4  ;;  %v1228_v4 = vld [vmem:[#allocation2 + $0x938] sm:$0xff] }
 0x5c2   :  { %1146 = vmatpush1.msra.mxu1 %v894_v5  ;;  %v1227_v5 = vld [vmem:[#allocation2 + $0x928] sm:$0xff] }
 0x5c3   :  { %1147 = vmatprep.subr.mxu1 %v893_v6  ;;  %v1226_v6 = vld [vmem:[#allocation2 + $0x918] sm:$0xff] }
 0x5c4   :  { %1148 = vmatpush1.msra.mxu1 %v892_v8  ;;  %v1225_v8 = vld [vmem:[#allocation2 + $0x908] sm:$0xff] }
 0x5c5   :  { %1149 = vmatprep.subr.mxu1 %v891_v17  ;;  %v1304_v17 = vld [vmem:[#allocation2 + $0xbf8] sm:$0xff] }
 0x5c6   :  { %1150 = vmatpush1.msra.mxu1 %v890_v9  ;;  %v1272_v9 = vld [vmem:[#allocation2 + $0xaf8] sm:$0xff] }
 0x5c7   :  { %1151 = vmatprep.subr.mxu1 %v889_v10  ;;  %v1271_v10 = vld [vmem:[#allocation2 + $0xaf0] sm:$0xff] }
 0x5c8   :  { %1152 = vmatpush1.msra.mxu1 %v888_v11  ;;  %v1270_v11 = vld [vmem:[#allocation2 + $0xae8] sm:$0xff] }
 0x5c9   :  { %1153 = vmatprep.subr.mxu1 %v887_v12  ;;  %v1269_v12 = vld [vmem:[#allocation2 + $0xae0] sm:$0xff] }
 0x5ca   :  { %1154 = vmatpush1.msra.mxu1 %v886_v13  ;;  %v1268_v13 = vld [vmem:[#allocation2 + $0xad8] sm:$0xff] }
 0x5cb   :  { %1155 = vmatprep.subr.mxu1 %v885_v14  ;;  %v1267_v14 = vld [vmem:[#allocation2 + $0xad0] sm:$0xff] }
 0x5cc   :  { %1156 = vmatpush1.msra.mxu1 %v884_v15  ;;  %v1266_v15 = vld [vmem:[#allocation2 + $0xac8] sm:$0xff] }
 0x5cd   :  { %1157 = vmatprep.subr.mxu1 %v883_v16  ;;  %v1265_v16 = vld [vmem:[#allocation2 + $0xac0] sm:$0xff] }
 0x5ce   :  { %1158 = vmatpush1.msra.mxu1 %v882_v18  ;;  %v1264_v18 = vld [vmem:[#allocation2 + $0xab8] sm:$0xff] }
 0x5cf   :  { %1159 = vmatprep.subr.mxu1 %v881_v33  ;;  %v1263_v33 = vld [vmem:[#allocation2 + $0xab0] sm:$0xff] }
 0x5d0   :  { %1160 = vmatpush1.msra.mxu1 %v880_v19  ;;  %v1262_v19 = vld [vmem:[#allocation2 + $0xaa8] sm:$0xff] }
 0x5d1   :  { %1194 = vmatmul.mubr.f32.vlgmr.msra.gmra.mxu1 %v2201_v7  ;;  %1991 = vmatprep.subr.mxu1 %v2064_v0 }
 0x5d2   :  { %2023 = vmatprep.mubr.msk.f32.mxu1 %vm2065_vm0, %v2064_v0  ;;  %1992 = vmatpush3.msra.mxu1 %v1240_v49  ;;  %v1297_v49 = vld [vmem:[#allocation2 + $0xbc0] sm:$0xff] }
 0x5d3   :  { %1993 = vmatprep.subr.mxu1 %v2064_v0 }
 0x5d4   :  { %1994 = vmatpush3.msra.mxu1 %v1239_v50  ;;  %v1296_v50 = vld [vmem:[#allocation2 + $0xbb8] sm:$0xff] }
 0x5d5   :  { %1995 = vmatprep.subr.mxu1 %v2064_v0 }
 0x5d6   :  { %1996 = vmatpush3.msra.mxu1 %v1238_v51  ;;  %v1295_v51 = vld [vmem:[#allocation2 + $0xbb0] sm:$0xff] }
 0x5d7   :  { %1997 = vmatprep.subr.mxu1 %v2064_v0 }
 0x5d8   :  { %1998 = vmatpush3.msra.mxu1 %v1237_v53  ;;  %v1293_v53 = vld [vmem:[#allocation2 + $0xba0] sm:$0xff] }
 0x5d9   :  { %1999 = vmatprep.subr.mxu1 %v2064_v0 }
 0x5da   :  { %2000 = vmatpush3.msra.mxu1 %v1236_v57  ;;  %v1288_v57 = vld [vmem:[#allocation2 + $0xb78] sm:$0xff] }
 0x5db   :  { %2001 = vmatprep.subr.mxu1 %v2064_v0 }
 0x5dc   :  { %2002 = vmatpush3.msra.mxu1 %v1235_v59  ;;  %v1286_v59 = vld [vmem:[#allocation2 + $0xb68] sm:$0xff] }
 0x5dd   :  { %2003 = vmatprep.subr.mxu1 %v2064_v0 }
 0x5de   :  { %2004 = vmatpush3.msra.mxu1 %v1234_v62  ;;  %v1284_v62 = vld [vmem:[#allocation2 + $0xb58] sm:$0xff] }
 0x5df   :  { %2005 = vmatprep.subr.mxu1 %v2064_v0 }
 0x671   :  { %v1051_v24 = vpop.f32.mrf.mxu1 }
 0x672   :  { %vm1055_vm7 = vcmp.gt.f32.partialorder %v1051_v24, 0.0  ;;  %v1056_v26 = vmul.f32 0.2, %v1051_v24 }
 0x673   :  { %v1955_v27 = vpop.f32.mrf.mxu1 }
 0x674   :  { %v1057_v29 = vsel %vm1055_vm7, %v1051_v24, %v1056_v26  ;;  %v1257_v24 = vld [vmem:[#allocation2 + $0xa80] sm:$0xff]  ;;  %v1256_v26 = vld [vmem:[#allocation2 + $0xa78] sm:$0xff]  ;;  %v1255_v27 = vld [vmem:[#allocation2 + $0xa70] sm:$0xff] }
 0x675   :  { %1123 = vmatmul.mubr.f32.vlgmr.msra.gmra.mxu0 %v1057_v29  ;;  %v1253_v29 = vld [vmem:[#allocation2 + $0xa60] sm:$0xff] }
 0x676   :  { %1957 = vmatpush3.msra.mxu0 %v1224_v28  ;;  %1988 = vmatprep.mubr.msk.f32.mxu0 %vm2065_vm0, %v2064_v0  ;;  %v1254_v28 = vld [vmem:[#allocation2 + $0xa68] sm:$0xff] }
 0x677   :  { %1958 = vmatprep.subr.mxu0 %v2064_v0 }
 0x678   :  { %1959 = vmatpush3.msra.mxu0 %v1223_v30  ;;  %v1252_v30 = vld [vmem:[#allocation2 + $0xa58] sm:$0xff] }
 0x679   :  { %1960 = vmatprep.subr.mxu0 %v2064_v0 }
 0x67a   :  { %1961 = vmatpush3.msra.mxu0 %v1222_v31  ;;  %v1251_v31 = vld [vmem:[#allocation2 + $0xa50] sm:$0xff] }
 0x67b   :  { %1962 = vmatprep.subr.mxu0 %v2064_v0 }
 0x67c   :  { %1963 = vmatpush3.msra.mxu0 %v1221_v32  ;;  %v1250_v32 = vld [vmem:[#allocation2 + $0xa48] sm:$0xff] }
 0x67d   :  { %1964 = vmatprep.subr.mxu0 %v2064_v0 }
 0x67e   :  { %1965 = vmatpush3.msra.mxu0 %v1220_v34  ;;  %v1249_v34 = vld [vmem:[#allocation2 + $0xa40] sm:$0xff] }
 0x67f   :  { %1966 = vmatprep.subr.mxu0 %v2064_v0 }
 0x680   :  { %1967 = vmatpush3.msra.mxu0 %v1219_v35  ;;  %v1248_v35 = vld [vmem:[#allocation2 + $0xa38] sm:$0xff] }
 0x681   :  { %1968 = vmatprep.subr.mxu0 %v2064_v0 }
 0x682   :  { %1969 = vmatpush3.msra.mxu0 %v1218_v36  ;;  %v1247_v36 = vld [vmem:[#allocation2 + $0xa30] sm:$0xff] }
 0x683   :  { %1970 = vmatprep.subr.mxu0 %v2064_v0 }
 0x684   :  { %1971 = vmatpush3.msra.mxu0 %v1217_v37  ;;  %v1246_v37 = vld [vmem:[#allocation2 + $0xa28] sm:$0xff] }
 0x685   :  { %1972 = vmatprep.subr.mxu0 %v2064_v0 }
 0x686   :  { %1973 = vmatpush3.msra.mxu0 %v1216_v38  ;;  %v1245_v38 = vld [vmem:[#allocation2 + $0xa20] sm:$0xff] }
 0x687   :  { %1974 = vmatprep.subr.mxu0 %v2064_v0 }
 0x688   :  { %1975 = vmatpush3.msra.mxu0 %v1215_v39 }
 0x689   :  { %1976 = vmatprep.subr.mxu0 %v2064_v0 }
 0x68a   :  { %1977 = vmatpush3.msra.mxu0 %v1214_v40 }
 0x68b   :  { %1978 = vmatprep.subr.mxu0 %v2064_v0 }
 0x68c   :  { %1979 = vmatpush3.msra.mxu0 %v1213_v41 }
 0x68d   :  { %1980 = vmatprep.subr.mxu0 %v2064_v0 }
 0x68e   :  { %1981 = vmatpush3.msra.mxu0 %v1212_v42  ;;  %v1303_v42 = vld [vmem:[#allocation2 + $0xbf0] sm:$0xff] }
 0x68f   :  { %1982 = vmatprep.subr.mxu0 %v2064_v0 }
 0x690   :  { %1983 = vmatpush3.msra.mxu0 %v1211_v43 }
 0x691   :  { %1984 = vmatprep.subr.mxu0 %v2064_v0  ;;  %v1195_v48 = vpop.f32.mrf.mxu1 }
 0x692   :  { %1985 = vmatpush3.msra.mxu0 %v1210_v44  ;;  %v1302_v44 = vld [vmem:[#allocation2 + $0xbe8] sm:$0xff] }
 0x693   :  { %1986 = vmatprep.subr.mxu0 %v2064_v0  ;;  %v1197_v52 = vpop.f32.mrf.mxu1 }
 0x694   :  { %1987 = vmatpush3.msra.mxu0 %v1209_v45  ;;  %v1200_v55 = vadd.f32 %v1197_v52, %v2201_v7  ;;  %v1233_v7 = vld [vmem:[#allocation2 + $0x988] sm:$0xff]  ;;  %v1301_v45 = vld [vmem:[#allocation2 + $0xbe0] sm:$0xff] }
 0x695   :  { %2006 = vmatpush3.msra.mxu1 %v1233_v7  ;;  %1451 = vmatprep.subr.mxu0 %v1272_v9  ;;  %v1294_v52 = vld [vmem:[#allocation2 + $0xba8] sm:$0xff]  ;;  %v1283_v7 = vld [vmem:[#allocation2 + $0xb50] sm:$0xff]  ;;  %v1273_v9 = vld [vmem:[#allocation2 + $0xb00] sm:$0xff] }
 0x696   :  { %2007 = vmatprep.subr.mxu1 %v2064_v0 }
 0x697   :  { %2008 = vmatpush3.msra.mxu1 %v1232_v63  ;;  %v1282_v63 = vld [vmem:[#allocation2 + $0xb48] sm:$0xff] }
 0x698   :  { %2009 = vmatprep.subr.mxu1 %v2064_v0 }
 0x699   :  { %2010 = vmatpush3.msra.mxu1 %v1231_v1  ;;  %v1281_v1 = vld [vmem:[#allocation2 + $0xb40] sm:$0xff] }
 0x69a   :  { %2011 = vmatprep.subr.mxu1 %v2064_v0 }
 0x69b   :  { %2012 = vmatpush3.msra.mxu1 %v1230_v2  ;;  %v1280_v2 = vld [vmem:[#allocation2 + $0xb38] sm:$0xff] }
 0x69c   :  { %2013 = vmatprep.subr.mxu1 %v2064_v0 }
 0x69d   :  { %2014 = vmatpush3.msra.mxu1 %v1229_v3  ;;  %v1279_v3 = vld [vmem:[#allocation2 + $0xb30] sm:$0xff] }
 0x69e   :  { %2015 = vmatprep.subr.mxu1 %v2064_v0 }
 0x69f   :  { %2016 = vmatpush3.msra.mxu1 %v1228_v4  ;;  %v1278_v4 = vld [vmem:[#allocation2 + $0xb28] sm:$0xff] }
 0x6a0   :  { %2017 = vmatprep.subr.mxu1 %v2064_v0 }
 0x6a1   :  { %2018 = vmatpush3.msra.mxu1 %v1227_v5  ;;  %v1277_v5 = vld [vmem:[#allocation2 + $0xb20] sm:$0xff] }
 0x6a2   :  { %2019 = vmatprep.subr.mxu1 %v2064_v0 }
 0x6a3   :  { %2020 = vmatpush3.msra.mxu1 %v1226_v6  ;;  %v1276_v6 = vld [vmem:[#allocation2 + $0xb18] sm:$0xff] }
 0x6a4   :  { %2021 = vmatprep.subr.mxu1 %v2064_v0 }
 0x6a5   :  { %2022 = vmatpush3.msra.mxu1 %v1225_v8  ;;  %v1275_v8 = vld [vmem:[#allocation2 + $0xb10] sm:$0xff] }
 0x6a6   :  { %1522 = vmatprep.subr.mxu1 %v1304_v17  ;;  %v1274_v17 = vld [vmem:[#allocation2 + $0xb08] sm:$0xff] }
 0x735   :  { %v1124_v46 = vpop.f32.mrf.mxu0 }
 0x736   :  { %v1201_v47 = vmul.f32 1.442695, %v1124_v46  ;;  %1206 = vadd.xlane.f32.xlu1 %v1124_v46  ;;  %v1300_v46 = vld [vmem:[#allocation2 + $0xbd8] sm:$0xff] }
 0x737   :  { %v1126_v60 = vpop.f32.mrf.mxu0 }
 0x738   :  { %2035 = vpow2.f32 %v1201_v47  ;;  %v1299_v47 = vld [vmem:[#allocation2 + $0xbd0] sm:$0xff] }
 0x745   :  { %v2036_v54 = vpop.eup %2035 }
 0x746   :  { %v1203_v56 = vmul.f32 %v2036_v54, %v1195_v48  ;;  %v1298_v48 = vld [vmem:[#allocation2 + $0xbc8] sm:$0xff]  ;;  %v1292_v54 = vld [vmem:[#allocation2 + $0xb98] sm:$0xff] }
 0x748   :  { %v1204_v58 = vadd.f32 %v1203_v56, %v1200_v55  ;;  %v1291_v55 = vld [vmem:[#allocation2 + $0xb90] sm:$0xff]  ;;  %v1289_v56 = vld [vmem:[#allocation2 + $0xb80] sm:$0xff] }
 0x74a   :  { %v2244_v61 = vadd.f32 %v1204_v58, %v1126_v60  ;;  %v1287_v58 = vld [vmem:[#allocation2 + $0xb70] sm:$0xff]  ;;  %v1285_v60 = vld [vmem:[#allocation2 + $0xb60] sm:$0xff] }
 0x74c   :  { %1989 = vmatmul.mubr.f32.vlgmr.msra.gmra.mxu0 %v2244_v61 }
 0x74d   :  { %1515 = vmatprep.mubr.f32.mxu0 %v2064_v0  ;;  %1452 = vmatpush1.msra.mxu0 %v1271_v10  ;;  %v1244_v10 = vld [vmem:[#allocation2 + $0xa18] sm:$0xff] }
 0x74e   :  { %1453 = vmatprep.subr.mxu0 %v1270_v11  ;;  %v1243_v11 = vld [vmem:[#allocation2 + $0xa10] sm:$0xff] }
 0x74f   :  { %1454 = vmatpush1.msra.mxu0 %v1269_v12  ;;  %v1242_v12 = vld [vmem:[#allocation2 + $0xa08] sm:$0xff] }
 0x750   :  { %1455 = vmatprep.subr.mxu0 %v1268_v13  ;;  %v1241_v13 = vld [vmem:[#allocation2 + $0xa00] sm:$0xff] }
 0x751   :  { %1456 = vmatpush1.msra.mxu0 %v1267_v14 }
 0x752   :  { %1457 = vmatprep.subr.mxu0 %v1266_v15 }
 0x753   :  { %1458 = vmatpush1.msra.mxu0 %v1265_v16 }
 0x754   :  { %1459 = vmatprep.subr.mxu0 %v1264_v18 }
 0x755   :  { %1460 = vmatpush1.msra.mxu0 %v1263_v33 }
 0x756   :  { %1461 = vmatprep.subr.mxu0 %v1262_v19 }
 0x757   :  { %1462 = vmatpush1.msra.mxu0 %v1261_v20 }
 0x758   :  { %1463 = vmatprep.subr.mxu0 %v1260_v21 }
 0x759   :  { %1464 = vmatpush1.msra.mxu0 %v1259_v22  ;;  %v421_v22 = vpop.xlane.xlu0 %420 }
 0x75a   :  { %1465 = vmatprep.subr.mxu0 %v1258_v23 }
 0x75b   :  { %1466 = vmatpush1.msra.mxu0 %v1257_v24 }
 0x75c   :  { %1467 = vmatprep.subr.mxu0 %v1256_v26 }
 0x75d   :  { %1468 = vmatpush1.msra.mxu0 %v1255_v27  ;;  %v814_v26 = vpop.xlane.xlu0 %813 }
 0x75e   :  { %1469 = vmatprep.subr.mxu0 %v1254_v28 }
 0x75f   :  { %1470 = vmatpush1.msra.mxu0 %v1253_v29  ;;  %v815_v29 = vadd.f32 %v814_v26, %v421_v22 }
 0x760   :  { %1471 = vmatprep.subr.mxu0 %v1252_v30 }
 0x761   :  { %1472 = vmatpush1.msra.mxu0 %v1251_v31 }
 0x762   :  { %1473 = vmatprep.subr.mxu0 %v1250_v32 }
 0x763   :  { %1474 = vmatpush1.msra.mxu0 %v1249_v34 }
 0x764   :  { %1475 = vmatprep.subr.mxu0 %v1248_v35 }
 0x765   :  { %1476 = vmatpush1.msra.mxu0 %v1247_v36 }
 0x766   :  { %1477 = vmatprep.subr.mxu0 %v1246_v37 }
 0x767   :  { %1478 = vmatpush1.msra.mxu0 %v1245_v38 }
 0x768   :  { %1479 = vmatprep.subr.mxu0 %v1244_v10 }
 0x769   :  { %1480 = vmatpush1.msra.mxu0 %v1243_v11 }
 0x76a   :  { %1481 = vmatprep.subr.mxu0 %v1242_v12 }
 0x76b   :  { %1482 = vmatpush1.msra.mxu0 %v1241_v13 }
 0x7bf   :  { %v1207_v28 = vpop.xlane.xlu1 %1206 }
 0x7c0   :  { %v1208_v31 = vadd.f32 %v1207_v28, %v815_v29 }
 0x80c   :  { %v1371_v39 = vpop.f32.mrf.mxu0 }
 0x80d   :  { %vm1375_vm8 = vcmp.gt.f32.partialorder %v1371_v39, 0.0  ;;  %v1376_v40 = vmul.f32 0.2, %v1371_v39 }
 0x80e   :  { %v1990_v41 = vpop.f32.mrf.mxu0 }
 0x80f   :  { %v1377_v43 = vsel %vm1375_vm8, %v1371_v39, %v1376_v40 }
 0x810   :  { %2024 = vmatmul.mubr.f32.vlgmr.msra.gmra.mxu1 %v1377_v43 }
 0x811   :  { %1523 = vmatpush1.msra.mxu1 %v1303_v42  ;;  %1586 = vmatprep.mubr.f32.mxu1 %v2064_v0  ;;  %v1290_v0 = vld [vmem:[#allocation2 + $0xb88] sm:$0xff] }
 0x812   :  { %1524 = vmatprep.subr.mxu1 %v1302_v44 }
 0x813   :  { %1525 = vmatpush1.msra.mxu1 %v1301_v45 }
 0x814   :  { %1526 = vmatprep.subr.mxu1 %v1300_v46 }
 0x815   :  { %1527 = vmatpush1.msra.mxu1 %v1299_v47 }
 0x816   :  { %1528 = vmatprep.subr.mxu1 %v1298_v48 }
 0x817   :  { %1529 = vmatpush1.msra.mxu1 %v1297_v49 }
 0x818   :  { %1530 = vmatprep.subr.mxu1 %v1296_v50 }
 0x819   :  { %1531 = vmatpush1.msra.mxu1 %v1295_v51 }
 0x81a   :  { %1532 = vmatprep.subr.mxu1 %v1294_v52 }
 0x81b   :  { %1533 = vmatpush1.msra.mxu1 %v1293_v53 }
 0x81c   :  { %1534 = vmatprep.subr.mxu1 %v1292_v54 }
 0x81d   :  { %1535 = vmatpush1.msra.mxu1 %v1291_v55 }
 0x81e   :  { %1536 = vmatprep.subr.mxu1 %v1290_v0 }
 0x81f   :  { %1537 = vmatpush1.msra.mxu1 %v1289_v56 }
 0x820   :  { %1538 = vmatprep.subr.mxu1 %v1288_v57 }
 0x821   :  { %1539 = vmatpush1.msra.mxu1 %v1287_v58 }
 0x822   :  { %1540 = vmatprep.subr.mxu1 %v1286_v59 }
 0x823   :  { %1541 = vmatpush1.msra.mxu1 %v1285_v60 }
 0x824   :  { %1542 = vmatprep.subr.mxu1 %v1284_v62 }
 0x825   :  { %1543 = vmatpush1.msra.mxu1 %v1283_v7 }
 0x826   :  { %1544 = vmatprep.subr.mxu1 %v1282_v63 }
 0x827   :  { %1545 = vmatpush1.msra.mxu1 %v1281_v1 }
 0x828   :  { %1546 = vmatprep.subr.mxu1 %v1280_v2 }
 0x829   :  { %1547 = vmatpush1.msra.mxu1 %v1279_v3 }
 0x82a   :  { %1548 = vmatprep.subr.mxu1 %v1278_v4 }
 0x82b   :  { %1549 = vmatpush1.msra.mxu1 %v1277_v5 }
 0x82c   :  { %1550 = vmatprep.subr.mxu1 %v1276_v6 }
 0x82d   :  { %1551 = vmatpush1.msra.mxu1 %v1275_v8 }
 0x82e   :  { %1552 = vmatprep.subr.mxu1 %v1274_v17 }
 0x82f   :  { %1553 = vmatpush1.msra.mxu1 %v1273_v9 }
 0x830   :  { %1587 = vmatmul.mubr.f32.vlgmr.msra.gmra.mxu1 %v2244_v61 }
 0x8d0   :  { %v1444_v14 = vpop.f32.mrf.mxu1 }
 0x8d1   :  { %vm1448_vm9 = vcmp.gt.f32.partialorder %v1444_v14, 0.0  ;;  %v1449_v15 = vmul.f32 0.2, %v1444_v14 }
 0x8d2   :  { %v2025_v16 = vpop.f32.mrf.mxu1 }
 0x8d3   :  { %v1450_v18 = vsel %vm1448_vm9, %v1444_v14, %v1449_v15 }
 0x8d4   :  { %1516 = vmatmul.mubr.f32.vlgmr.msra.gmra.mxu0 %v1450_v18 }
 0x8f0   :  { %v1588_v20 = vpop.f32.mrf.mxu1 }
 0x8f2   :  { %v1590_v23 = vpop.f32.mrf.mxu1 }
 0x8f3   :  { %v1593_v27 = vadd.f32 %v1590_v23, %v2244_v61 }
 0x994   :  { %v1517_v33 = vpop.f32.mrf.mxu0 }
 0x995   :  { %1599 = vadd.xlane.f32.xlu1 %v1517_v33  ;;  %v1594_v19 = vmul.f32 1.442695, %v1517_v33 }
 0x996   :  { %v1519_v32 = vpop.f32.mrf.mxu0 }
 0x997   :  { %2037 = vpow2.f32 %v1594_v19 }
 0x9a4   :  { %v2038_v21 = vpop.eup %2037 }
 0x9a5   :  { %v1596_v24 = vmul.f32 %v2038_v21, %v1588_v20 }
 0x9a7   :  { %v1597_v30 = vadd.f32 %v1596_v24, %v1593_v27 }
 0x9a9   :  { %v1598_v35 = vadd.f32 %v1597_v30, %v1519_v32 }
 0xa1e   :  { %v1600_v34 = vpop.xlane.xlu1 %1599 }
 0xa1f   :  { %v1601_v36 = vadd.f32 %v1600_v34, %v1208_v31 }
 0xa21   :  { %v1603_v37 = vsel %vm1602_vm10, %v1601_v36, %v1598_v35 }
 0xa22   :  { %1604 = vst [vmem:[%s2268_s2] sm:$0xff] %v1603_v37 }
 0xa23   :  { %1609 = vsyncpa [#allocation3], 1 }

</bundles_post_ra>
